<compile_context>
chip_gen: v7x
topology: tpu7x:2x2x1
jax: 0.10.0
libtpu: 0.0.40
codegen_flags: <defaults>
</compile_context>

<pallas_src>
import numpy as np
import jax
import jax.numpy as jnp
from jax import lax
from jax.experimental import pallas as pl
from jax.experimental.pallas import tpu as pltpu


# ------------------------------ static sizes --------------------------------

HSLOT = 40        # rows per image in the row-major slab (32 valid + 8 zero pad)
B_PAD = 8         # output rows per batch tile (sublane aligned)
MAX_B = 4         # images per grid step (keeps register pressure comfortable)


# ------------------------------ fused kernel --------------------------------

def _make_lenet_kernel(b):
    """Builds the kernel for a batch tile of `b` images."""
    m = (b - 1) * HSLOT + 32          # rows that carry data (always a multiple of 8)
    f32 = jnp.float32
    bf16 = jnp.bfloat16

    def kernel(x_ref, w0_ref, b0_ref, w1_ref, b1_ref, w2_ref, b2_ref,
               w3_ref, b3_ref, w4_ref, b4_ref, out_ref,
               a0_ref, p0_ref, a1_ref, p1_ref):
        # Zero the 8 tail rows that shifted reads may touch (keeps junk finite &
        # deterministic; junk rows/lanes are never consumed by valid outputs).
        a0_ref[pl.ds(m, 8), :] = jnp.zeros((8, 256), f32)
        p0_ref[pl.ds(m, 8), :] = jnp.zeros((8, 128), f32)
        a1_ref[pl.ds(m, 8), :] = jnp.zeros((8, 256), f32)

        # ---- conv0 (5x5 valid): 5 row-shifted matmuls.  Input lane = 4*w + ic,
        #      output lane = 8*(ow//2) + oc  (+128 if ow is odd).  Bias folded in.
        for ki in range(5):
            tap = x_ref[pl.ds(ki, m), :].astype(bf16)                     # (m, 128)
            contrib = jnp.dot(tap, w0_ref[ki], preferred_element_type=f32)
            if ki == 0:
                a0_ref[pl.ds(0, m), :] = contrib + b0_ref[...]
            else:
                a0_ref[pl.ds(0, m), :] += contrib

        # ---- ReLU + 2x2/2 max-pool (fused), per image.
        #      pooled (p, q, c) lands at row 2p (of the image block), lane 8q + c.
        for i in range(b):
            r0 = i * HSLOT
            t = jnp.maximum(a0_ref[pl.ds(r0, 32), :], a0_ref[pl.ds(r0 + 1, 32), :])
            p0_ref[pl.ds(r0, 32), :] = jnp.maximum(
                jnp.maximum(t[:, 0:128], t[:, 128:256]), 0.0)

        # ---- conv1 (5x5 valid on the pooled 14x14 grid): stride-2 row shifts.
        #      Input lane = 8*q + c, output lane = 16*(s//2) + o (+128 if s odd).
        for ki in range(5):
            tap = p0_ref[pl.ds(2 * ki, m), :].astype(bf16)                # (m, 128)
            contrib = jnp.dot(tap, w1_ref[ki], preferred_element_type=f32)
            if ki == 0:
                a1_ref[pl.ds(0, m), :] = contrib + b1_ref[...]
            else:
                a1_ref[pl.ds(0, m), :] += contrib

        # ---- ReLU + 2x2/2 max-pool (fused), per image.
        #      pooled (p, q, o) lands at row 4p, lane 16q + o.
        for i in range(b):
            r0 = i * HSLOT
            t = jnp.maximum(a1_ref[pl.ds(r0, 32), :], a1_ref[pl.ds(r0 + 2, 32), :])
            p1_ref[pl.ds(r0, 32), :] = jnp.maximum(
                jnp.maximum(t[:, 0:128], t[:, 128:256]), 0.0)

        # ---- fc2: flatten folded into 5 reordered weight slabs (one per pooled row p).
        h2 = jnp.broadcast_to(b2_ref[...], (b, 120))
        for p in range(5):
            rows = [p1_ref[pl.ds(i * HSLOT + 4 * p, 1), :] for i in range(b)]
            slab = jnp.concatenate(rows, axis=0) if b > 1 else rows[0]    # (b, 128)
            h2 = h2 + jnp.dot(slab, w2_ref[p], preferred_element_type=f32)
        h2 = jnp.maximum(h2, 0.0)

        # ---- fc3 / fc4 (batched, f32).
        h3 = jnp.maximum(jnp.dot(h2, w3_ref[...], preferred_element_type=f32)
                         + b3_ref[...], 0.0)
        h4 = jnp.dot(h3, w4_ref[...], preferred_element_type=f32) + b4_ref[...]

        out_ref[...] = jnp.zeros((B_PAD, 128), f32)
        out_ref[0:b, 0:10] = h4

    return kernel


# --------------------------- host-side weight prep --------------------------

def prepare_lenet_params(params):
    """One-time repack of PyTorch-layout weights into the kernel's banded layout."""
    w0 = np.asarray(params["w0"], np.float32)   # (6, 3, 5, 5)
    b0 = np.asarray(params["b0"], np.float32)   # (6,)
    w1 = np.asarray(params["w1"], np.float32)   # (16, 6, 5, 5)
    b1 = np.asarray(params["b1"], np.float32)   # (16,)
    w2 = np.asarray(params["w2"], np.float32)   # (120, 400)
    b2 = np.asarray(params["b2"], np.float32)   # (120,)
    w3 = np.asarray(params["w3"], np.float32)   # (84, 120)
    b3 = np.asarray(params["b3"], np.float32)   # (84,)
    w4 = np.asarray(params["w4"], np.float32)   # (10, 84)
    b4 = np.asarray(params["b4"], np.float32)   # (10,)

    # conv0 banded weights: W0[ki, 4*w + ic, col(ow) + oc] = w0[oc, ic, ki, w - ow]
    W0 = np.zeros((5, 128, 256), np.float32)
    for ki in range(5):
        for kj in range(5):
            blk = w0[:, :, ki, kj].T                          # (ic=3, oc=6)
            for ow in range(28):
                w = ow + kj
                col = 8 * (ow // 2) + (128 if ow % 2 else 0)
                W0[ki, 4 * w:4 * w + 3, col:col + 6] = blk
    b0v = np.zeros((1, 256), np.float32)
    for q in range(14):
        b0v[0, 8 * q:8 * q + 6] = b0
        b0v[0, 128 + 8 * q:128 + 8 * q + 6] = b0

    # conv1 banded weights: W1[ki, 8*q + c, col(s) + o] = w1[o, c, ki, q - s]
    W1 = np.zeros((5, 128, 256), np.float32)
    for ki in range(5):
        for kj in range(5):
            blk = w1[:, :, ki, kj].T                          # (c=6, o=16)
            for s in range(10):
                q = s + kj
                col = 16 * (s // 2) + (128 if s % 2 else 0)
                W1[ki, 8 * q:8 * q + 6, col:col + 16] = blk
    b1v = np.zeros((1, 256), np.float32)
    for q in range(5):
        b1v[0, 16 * q:16 * q + 16] = b1
        b1v[0, 128 + 16 * q:128 + 16 * q + 16] = b1

    # fc2 folded over pooled row index p: W2[p, 16*q + o, j] = w2[j, o*25 + 5p + q]
    w2r = w2.reshape(120, 16, 5, 5)                           # (j, o, p, q)
    W2 = np.zeros((5, 128, 120), np.float32)
    for p in range(5):
        for q in range(5):
            W2[p, 16 * q:16 * q + 16, :] = w2r[:, :, p, q].T  # (o, j)

    return dict(
        w0=jnp.asarray(W0, jnp.bfloat16), b0=jnp.asarray(b0v),
        w1=jnp.asarray(W1, jnp.bfloat16), b1=jnp.asarray(b1v),
        w2=jnp.asarray(W2), b2=jnp.asarray(b2.reshape(1, 120)),
        w3=jnp.asarray(np.ascontiguousarray(w3.T)), b3=jnp.asarray(b3.reshape(1, 84)),
        w4=jnp.asarray(np.ascontiguousarray(w4.T)), b4=jnp.asarray(b4.reshape(1, 10)),
    )


# ------------------------------ forward wrapper ------------------------------

def lenet_apply(prepped, x):
    """x: (N, 3, 32, 32) float32 NCHW -> logits (N, 10)."""
    n = x.shape[0]
    assert x.shape[1:] == (3, 32, 32)

    b = min(n, MAX_B)                               # images per grid step
    n_tiles = -(-n // b)
    n_pad = n_tiles * b
    if n_pad != n:
        x = jnp.pad(x, ((0, n_pad - n), (0, 0), (0, 0), (0, 0)))

    # layout prep (cheap): rows = h (padded 32->40), lanes = 4*w + c (c padded 3->4).
    xr = jnp.transpose(x, (0, 2, 3, 1))                                  # (n, 32, 32, 3)
    xr = jnp.pad(xr, ((0, 0), (0, HSLOT - 32), (0, 0), (0, 1)))          # (n, 40, 32, 4)
    xr = xr.reshape(n_pad * HSLOT, 128).astype(jnp.float32)

    flops = 2 * n_pad * (28 * 28 * 75 * 6 + 10 * 10 * 150 * 16
                         + 400 * 120 + 120 * 84 + 84 * 10)
    bytes_accessed = (xr.size * 4
                      + sum(int(v.size) * v.dtype.itemsize for v in prepped.values())
                      + n_tiles * B_PAD * 128 * 4)

    out_padded = pl.pallas_call(
        _make_lenet_kernel(b),
        out_shape=jax.ShapeDtypeStruct((n_tiles * B_PAD, 128), jnp.float32),
        grid_spec=pltpu.PrefetchScalarGridSpec(
            num_scalar_prefetch=0,
            grid=(n_tiles,),
            in_specs=[
                pl.BlockSpec((b * HSLOT, 128), lambda i: (i, 0)),        # x tile
                pl.BlockSpec((5, 128, 256), lambda i: (0, 0, 0)),        # W0
                pl.BlockSpec((1, 256), lambda i: (0, 0)),                # b0
                pl.BlockSpec((5, 128, 256), lambda i: (0, 0, 0)),        # W1
                pl.BlockSpec((1, 256), lambda i: (0, 0)),                # b1
                pl.BlockSpec((5, 128, 120), lambda i: (0, 0, 0)),        # W2
                pl.BlockSpec((1, 120), lambda i: (0, 0)),                # b2
                pl.BlockSpec((120, 84), lambda i: (0, 0)),               # w3
                pl.BlockSpec((1, 84), lambda i: (0, 0)),                 # b3
                pl.BlockSpec((84, 10), lambda i: (0, 0)),                # w4
                pl.BlockSpec((1, 10), lambda i: (0, 0)),                 # b4
            ],
            out_specs=pl.BlockSpec((B_PAD, 128), lambda i: (i, 0)),
            scratch_shapes=[
                pltpu.VMEM((b * HSLOT, 256), jnp.float32),               # conv0 acc
                pltpu.VMEM((b * HSLOT, 128), jnp.float32),               # pool0
                pltpu.VMEM((b * HSLOT, 256), jnp.float32),               # conv1 acc
                pltpu.VMEM((b * HSLOT, 128), jnp.float32),               # pool1
            ]),
        compiler_params=pltpu.CompilerParams(
            dimension_semantics=("parallel",),
            vmem_limit_bytes=32 * 1024 * 1024),
        cost_estimate=pl.CostEstimate(flops=flops, transcendentals=0,
                                      bytes_accessed=bytes_accessed),
    )(xr, prepped["w0"], prepped["b0"], prepped["w1"], prepped["b1"],
      prepped["w2"], prepped["b2"], prepped["w3"], prepped["b3"],
      prepped["w4"], prepped["b4"])

    logits = out_padded.reshape(n_tiles, B_PAD, 128)[:, :b, :10].reshape(n_pad, 10)
    return logits[:n]


def lenet_forward(params, x):
    """Convenience wrapper: PyTorch-layout params -> logits."""
    return lenet_apply(prepare_lenet_params(params), x)


# ------------------------------ parameters ----------------------------------

def _uniform(key, shape, bound):
    return jax.random.uniform(key, shape, jnp.float32, minval=-bound, maxval=bound)


def init_lenet_params(key):
    ks = jax.random.split(key, 10)
    params = {}
    fan0 = 3 * 5 * 5
    params["w0"] = _uniform(ks[0], (6, 3, 5, 5), 1.0 / jnp.sqrt(fan0))
    params["b0"] = _uniform(ks[1], (6,), 1.0 / jnp.sqrt(fan0))
    fan1 = 6 * 5 * 5
    params["w1"] = _uniform(ks[2], (16, 6, 5, 5), 1.0 / jnp.sqrt(fan1))
    params["b1"] = _uniform(ks[3], (16,), 1.0 / jnp.sqrt(fan1))
    params["w2"] = _uniform(ks[4], (120, 400), 1.0 / jnp.sqrt(400.0))
    params["b2"] = _uniform(ks[5], (120,), 1.0 / jnp.sqrt(400.0))
    params["w3"] = _uniform(ks[6], (84, 120), 1.0 / jnp.sqrt(120.0))
    params["b3"] = _uniform(ks[7], (84,), 1.0 / jnp.sqrt(120.0))
    params["w4"] = _uniform(ks[8], (10, 84), 1.0 / jnp.sqrt(84.0))
    params["b4"] = _uniform(ks[9], (10,), 1.0 / jnp.sqrt(84.0))
    return params


# ------------------------------ plain-JAX reference --------------------------

def lenet_reference(params, x):
    dn = ("NCHW", "OIHW", "NCHW")
    hp = lax.Precision.HIGHEST
    y = lax.conv_general_dilated(x, params["w0"], (1, 1), "VALID",
                                 dimension_numbers=dn, precision=hp)
    y = jnp.maximum(y + params["b0"][None, :, None, None], 0.0)
    y = lax.reduce_window(y, -jnp.inf, lax.max, (1, 1, 2, 2), (1, 1, 2, 2), "VALID")
    y = lax.conv_general_dilated(y, params["w1"], (1, 1), "VALID",
                                 dimension_numbers=dn, precision=hp)
    y = jnp.maximum(y + params["b1"][None, :, None, None], 0.0)
    y = lax.reduce_window(y, -jnp.inf, lax.max, (1, 1, 2, 2), (1, 1, 2, 2), "VALID")
    y = y.reshape(y.shape[0], -1)
    y = jnp.maximum(jnp.dot(y, params["w2"].T, precision=hp) + params["b2"], 0.0)
    y = jnp.maximum(jnp.dot(y, params["w3"].T, precision=hp) + params["b3"], 0.0)
    y = jnp.dot(y, params["w4"].T, precision=hp) + params["b4"]
    return y


# ---------------------------------- main -------------------------------------

if __name__ == "__main__":
    key = jax.random.PRNGKey(0)
    pkey, xkey = jax.random.split(key)
    params = init_lenet_params(pkey)

    # LeNet's 400-wide flatten requires 32x32 spatial input (CIFAR-10); batch = 2.
    x = jax.random.normal(xkey, (2, 3, 32, 32), dtype=jnp.float32)

    prepped = prepare_lenet_params(params)          # numpy repack (one-time, host)
    out = jax.jit(lenet_apply)(prepped, x)
    out = jax.block_until_ready(out)
    assert out.shape == (2, 10) and out.dtype == jnp.float32

    ref = jax.jit(lenet_reference)(params, x)
    err = float(jnp.max(jnp.abs(out - ref)))
    assert err < 5e-2, f"mismatch vs reference: max abs err = {err}"

    print("KERNEL_OK")
</pallas_src>

<mosaic_0001>
module attributes {stable_mosaic.version = 11 : i64} {
  func.func @kernel(%arg0: i32, %arg1: memref<80x128xf32, #tpu.memory_space<vmem>>, %arg2: memref<5x128x256xbf16, #tpu.memory_space<vmem>>, %arg3: memref<1x256xf32, #tpu.memory_space<vmem>>, %arg4: memref<5x128x256xbf16, #tpu.memory_space<vmem>>, %arg5: memref<1x256xf32, #tpu.memory_space<vmem>>, %arg6: memref<5x128x120xf32, #tpu.memory_space<vmem>>, %arg7: memref<1x120xf32, #tpu.memory_space<vmem>>, %arg8: memref<120x84xf32, #tpu.memory_space<vmem>>, %arg9: memref<1x84xf32, #tpu.memory_space<vmem>>, %arg10: memref<84x10xf32, #tpu.memory_space<vmem>>, %arg11: memref<1x10xf32, #tpu.memory_space<vmem>>, %arg12: memref<8x128xf32, #tpu.memory_space<vmem>>, %arg13: memref<80x256xf32, #tpu.memory_space<vmem>>, %arg14: memref<80x128xf32, #tpu.memory_space<vmem>>, %arg15: memref<80x256xf32, #tpu.memory_space<vmem>>, %arg16: memref<80x128xf32, #tpu.memory_space<vmem>>) attributes {dimension_semantics = [#tpu.dimension_semantics<parallel>], iteration_bounds = array<i64: 1>, scalar_prefetch = 0 : i64, scratch_operands = 4 : i64, tpu.core_type = #tpu.core_type<tc>, window_params = [{transform_indices = @transform_0, window_bounds = array<i64: 80, 128>}, {pipeline_mode = #tpu.pipeline_mode<synchronous>, transform_indices = @transform_1, window_bounds = array<i64: 5, 128, 256>}, {pipeline_mode = #tpu.pipeline_mode<synchronous>, transform_indices = @transform_2, window_bounds = array<i64: 1, 256>}, {pipeline_mode = #tpu.pipeline_mode<synchronous>, transform_indices = @transform_3, window_bounds = array<i64: 5, 128, 256>}, {pipeline_mode = #tpu.pipeline_mode<synchronous>, transform_indices = @transform_4, window_bounds = array<i64: 1, 256>}, {pipeline_mode = #tpu.pipeline_mode<synchronous>, transform_indices = @transform_5, window_bounds = array<i64: 5, 128, 120>}, {pipeline_mode = #tpu.pipeline_mode<synchronous>, transform_indices = @transform_6, window_bounds = array<i64: 1, 120>}, {pipeline_mode = #tpu.pipeline_mode<synchronous>, transform_indices = @transform_7, window_bounds = array<i64: 120, 84>}, {pipeline_mode = #tpu.pipeline_mode<synchronous>, transform_indices = @transform_8, window_bounds = array<i64: 1, 84>}, {pipeline_mode = #tpu.pipeline_mode<synchronous>, transform_indices = @transform_9, window_bounds = array<i64: 84, 10>}, {pipeline_mode = #tpu.pipeline_mode<synchronous>, transform_indices = @transform_10, window_bounds = array<i64: 1, 10>}, {transform_indices = @transform_11, window_bounds = array<i64: 8, 128>}]} {
    %cst = arith.constant 0.000000e+00 : f32
    %0 = vector.broadcast %cst : f32 to vector<8x256xf32>
    %c72 = arith.constant 72 : index
    %c0 = arith.constant 0 : index
    %1 = vector.load %arg13[%c72, %c0] : memref<80x256xf32, #tpu.memory_space<vmem>>, vector<8x256xf32>
    tpu.vector_store %arg13[%c72, %c0], %0 {strides = array<i32>} : memref<80x256xf32, #tpu.memory_space<vmem>>, vector<8x256xf32>,
    %cst_0 = arith.constant 0.000000e+00 : f32
    %2 = vector.broadcast %cst_0 : f32 to vector<8x128xf32>
    %c72_1 = arith.constant 72 : index
    %c0_2 = arith.constant 0 : index
    %3 = vector.load %arg14[%c72_1, %c0_2] : memref<80x128xf32, #tpu.memory_space<vmem>>, vector<8x128xf32>
    tpu.vector_store %arg14[%c72_1, %c0_2], %2 {strides = array<i32>} : memref<80x128xf32, #tpu.memory_space<vmem>>, vector<8x128xf32>,
    %cst_3 = arith.constant 0.000000e+00 : f32
    %4 = vector.broadcast %cst_3 : f32 to vector<8x256xf32>
    %c72_4 = arith.constant 72 : index
    %c0_5 = arith.constant 0 : index
    %5 = vector.load %arg15[%c72_4, %c0_5] : memref<80x256xf32, #tpu.memory_space<vmem>>, vector<8x256xf32>
    tpu.vector_store %arg15[%c72_4, %c0_5], %4 {strides = array<i32>} : memref<80x256xf32, #tpu.memory_space<vmem>>, vector<8x256xf32>,
    %c0_6 = arith.constant 0 : index
    %c0_7 = arith.constant 0 : index
    %6 = vector.load %arg1[%c0_6, %c0_7] : memref<80x128xf32, #tpu.memory_space<vmem>>, vector<72x128xf32>
    %7 = arith.truncf %6 : vector<72x128xf32> to vector<72x128xbf16>
    %c0_8 = arith.constant 0 : index
    %c0_9 = arith.constant 0 : index
    %c0_10 = arith.constant 0 : index
    %8 = vector.load %arg2[%c0_8, %c0_9, %c0_10] : memref<5x128x256xbf16, #tpu.memory_space<vmem>>, vector<1x128x256xbf16>
    %9 = vector.shape_cast %8 : vector<1x128x256xbf16> to vector<128x256xbf16>
    %cst_11 = arith.constant dense<0.000000e+00> : vector<72x256xf32>
    %10 = tpu.matmul %7, %9, %cst_11 {dimension_numbers = #tpu.dot_dimension_numbers<[1], [0], [0], [1], [0, 0, 1, 1], [], []>} : vector<72x128xbf16>, vector<128x256xbf16>, vector<72x256xf32> -> vector<72x256xf32>
    %c0_12 = arith.constant 0 : index
    %c0_13 = arith.constant 0 : index
    %11 = vector.load %arg3[%c0_12, %c0_13] : memref<1x256xf32, #tpu.memory_space<vmem>>, vector<1x256xf32>
    %12 = vector.broadcast %11 : vector<1x256xf32> to vector<72x256xf32>
    %13 = arith.addf %10, %12 : vector<72x256xf32>
    %c0_14 = arith.constant 0 : index
    %c0_15 = arith.constant 0 : index
    %14 = vector.load %arg13[%c0_14, %c0_15] : memref<80x256xf32, #tpu.memory_space<vmem>>, vector<72x256xf32>
    tpu.vector_store %arg13[%c0_14, %c0_15], %13 {strides = array<i32>} : memref<80x256xf32, #tpu.memory_space<vmem>>, vector<72x256xf32>,
    %c1 = arith.constant 1 : index
    %c0_16 = arith.constant 0 : index
    %15 = vector.load %arg1[%c1, %c0_16] : memref<80x128xf32, #tpu.memory_space<vmem>>, vector<72x128xf32>
    %16 = arith.truncf %15 : vector<72x128xf32> to vector<72x128xbf16>
    %c1_17 = arith.constant 1 : index
    %c0_18 = arith.constant 0 : index
    %c0_19 = arith.constant 0 : index
    %17 = vector.load %arg2[%c1_17, %c0_18, %c0_19] : memref<5x128x256xbf16, #tpu.memory_space<vmem>>, vector<1x128x256xbf16>
    %18 = vector.shape_cast %17 : vector<1x128x256xbf16> to vector<128x256xbf16>
    %cst_20 = arith.constant dense<0.000000e+00> : vector<72x256xf32>
    %19 = tpu.matmul %16, %18, %cst_20 {dimension_numbers = #tpu.dot_dimension_numbers<[1], [0], [0], [1], [0, 0, 1, 1], [], []>} : vector<72x128xbf16>, vector<128x256xbf16>, vector<72x256xf32> -> vector<72x256xf32>
    %c0_21 = arith.constant 0 : index
    %c0_22 = arith.constant 0 : index
    %20 = vector.load %arg13[%c0_21, %c0_22] : memref<80x256xf32, #tpu.memory_space<vmem>>, vector<72x256xf32>
    %21 = arith.addf %20, %19 : vector<72x256xf32>
    %c0_23 = arith.constant 0 : index
    %c0_24 = arith.constant 0 : index
    %22 = vector.load %arg13[%c0_23, %c0_24] : memref<80x256xf32, #tpu.memory_space<vmem>>, vector<72x256xf32>
    tpu.vector_store %arg13[%c0_23, %c0_24], %21 {strides = array<i32>} : memref<80x256xf32, #tpu.memory_space<vmem>>, vector<72x256xf32>,
    %c2 = arith.constant 2 : index
    %c0_25 = arith.constant 0 : index
    %23 = vector.load %arg1[%c2, %c0_25] : memref<80x128xf32, #tpu.memory_space<vmem>>, vector<72x128xf32>
    %24 = arith.truncf %23 : vector<72x128xf32> to vector<72x128xbf16>
    %c2_26 = arith.constant 2 : index
    %c0_27 = arith.constant 0 : index
    %c0_28 = arith.constant 0 : index
    %25 = vector.load %arg2[%c2_26, %c0_27, %c0_28] : memref<5x128x256xbf16, #tpu.memory_space<vmem>>, vector<1x128x256xbf16>
    %26 = vector.shape_cast %25 : vector<1x128x256xbf16> to vector<128x256xbf16>
    %cst_29 = arith.constant dense<0.000000e+00> : vector<72x256xf32>
    %27 = tpu.matmul %24, %26, %cst_29 {dimension_numbers = #tpu.dot_dimension_numbers<[1], [0], [0], [1], [0, 0, 1, 1], [], []>} : vector<72x128xbf16>, vector<128x256xbf16>, vector<72x256xf32> -> vector<72x256xf32>
    %c0_30 = arith.constant 0 : index
    %c0_31 = arith.constant 0 : index
    %28 = vector.load %arg13[%c0_30, %c0_31] : memref<80x256xf32, #tpu.memory_space<vmem>>, vector<72x256xf32>
    %29 = arith.addf %28, %27 : vector<72x256xf32>
    %c0_32 = arith.constant 0 : index
    %c0_33 = arith.constant 0 : index
    %30 = vector.load %arg13[%c0_32, %c0_33] : memref<80x256xf32, #tpu.memory_space<vmem>>, vector<72x256xf32>
    tpu.vector_store %arg13[%c0_32, %c0_33], %29 {strides = array<i32>} : memref<80x256xf32, #tpu.memory_space<vmem>>, vector<72x256xf32>,
    %c3 = arith.constant 3 : index
    %c0_34 = arith.constant 0 : index
    %31 = vector.load %arg1[%c3, %c0_34] : memref<80x128xf32, #tpu.memory_space<vmem>>, vector<72x128xf32>
    %32 = arith.truncf %31 : vector<72x128xf32> to vector<72x128xbf16>
    %c3_35 = arith.constant 3 : index
    %c0_36 = arith.constant 0 : index
    %c0_37 = arith.constant 0 : index
    %33 = vector.load %arg2[%c3_35, %c0_36, %c0_37] : memref<5x128x256xbf16, #tpu.memory_space<vmem>>, vector<1x128x256xbf16>
    %34 = vector.shape_cast %33 : vector<1x128x256xbf16> to vector<128x256xbf16>
    %cst_38 = arith.constant dense<0.000000e+00> : vector<72x256xf32>
    %35 = tpu.matmul %32, %34, %cst_38 {dimension_numbers = #tpu.dot_dimension_numbers<[1], [0], [0], [1], [0, 0, 1, 1], [], []>} : vector<72x128xbf16>, vector<128x256xbf16>, vector<72x256xf32> -> vector<72x256xf32>
    %c0_39 = arith.constant 0 : index
    %c0_40 = arith.constant 0 : index
    %36 = vector.load %arg13[%c0_39, %c0_40] : memref<80x256xf32, #tpu.memory_space<vmem>>, vector<72x256xf32>
    %37 = arith.addf %36, %35 : vector<72x256xf32>
    %c0_41 = arith.constant 0 : index
    %c0_42 = arith.constant 0 : index
    %38 = vector.load %arg13[%c0_41, %c0_42] : memref<80x256xf32, #tpu.memory_space<vmem>>, vector<72x256xf32>
    tpu.vector_store %arg13[%c0_41, %c0_42], %37 {strides = array<i32>} : memref<80x256xf32, #tpu.memory_space<vmem>>, vector<72x256xf32>,
    %c4 = arith.constant 4 : index
    %c0_43 = arith.constant 0 : index
    %39 = vector.load %arg1[%c4, %c0_43] : memref<80x128xf32, #tpu.memory_space<vmem>>, vector<72x128xf32>
    %40 = arith.truncf %39 : vector<72x128xf32> to vector<72x128xbf16>
    %c4_44 = arith.constant 4 : index
    %c0_45 = arith.constant 0 : index
    %c0_46 = arith.constant 0 : index
    %41 = vector.load %arg2[%c4_44, %c0_45, %c0_46] : memref<5x128x256xbf16, #tpu.memory_space<vmem>>, vector<1x128x256xbf16>
    %42 = vector.shape_cast %41 : vector<1x128x256xbf16> to vector<128x256xbf16>
    %cst_47 = arith.constant dense<0.000000e+00> : vector<72x256xf32>
    %43 = tpu.matmul %40, %42, %cst_47 {dimension_numbers = #tpu.dot_dimension_numbers<[1], [0], [0], [1], [0, 0, 1, 1], [], []>} : vector<72x128xbf16>, vector<128x256xbf16>, vector<72x256xf32> -> vector<72x256xf32>
    %c0_48 = arith.constant 0 : index
    %c0_49 = arith.constant 0 : index
    %44 = vector.load %arg13[%c0_48, %c0_49] : memref<80x256xf32, #tpu.memory_space<vmem>>, vector<72x256xf32>
    %45 = arith.addf %44, %43 : vector<72x256xf32>
    %c0_50 = arith.constant 0 : index
    %c0_51 = arith.constant 0 : index
    %46 = vector.load %arg13[%c0_50, %c0_51] : memref<80x256xf32, #tpu.memory_space<vmem>>, vector<72x256xf32>
    tpu.vector_store %arg13[%c0_50, %c0_51], %45 {strides = array<i32>} : memref<80x256xf32, #tpu.memory_space<vmem>>, vector<72x256xf32>,
    %c0_52 = arith.constant 0 : index
    %c0_53 = arith.constant 0 : index
    %47 = vector.load %arg13[%c0_52, %c0_53] : memref<80x256xf32, #tpu.memory_space<vmem>>, vector<32x256xf32>
    %c1_54 = arith.constant 1 : index
    %c0_55 = arith.constant 0 : index
    %48 = vector.load %arg13[%c1_54, %c0_55] : memref<80x256xf32, #tpu.memory_space<vmem>>, vector<32x256xf32>
    %49 = arith.maximumf %47, %48 : vector<32x256xf32>
    %50 = vector.extract_strided_slice %49 {offsets = [0, 0], sizes = [32, 128], strides = [1, 1]} : vector<32x256xf32> to vector<32x128xf32>
    %51 = vector.extract_strided_slice %49 {offsets = [0, 128], sizes = [32, 128], strides = [1, 1]} : vector<32x256xf32> to vector<32x128xf32>
    %52 = arith.maximumf %50, %51 : vector<32x128xf32>
    %cst_56 = arith.constant 0.000000e+00 : f32
    %53 = vector.broadcast %cst_56 : f32 to vector<32x128xf32>
    %54 = arith.maximumf %52, %53 : vector<32x128xf32>
    %c0_57 = arith.constant 0 : index
    %c0_58 = arith.constant 0 : index
    %55 = vector.load %arg14[%c0_57, %c0_58] : memref<80x128xf32, #tpu.memory_space<vmem>>, vector<32x128xf32>
    tpu.vector_store %arg14[%c0_57, %c0_58], %54 {strides = array<i32>} : memref<80x128xf32, #tpu.memory_space<vmem>>, vector<32x128xf32>,
    %c40 = arith.constant 40 : index
    %c0_59 = arith.constant 0 : index
    %56 = vector.load %arg13[%c40, %c0_59] : memref<80x256xf32, #tpu.memory_space<vmem>>, vector<32x256xf32>
    %c41 = arith.constant 41 : index
    %c0_60 = arith.constant 0 : index
    %57 = vector.load %arg13[%c41, %c0_60] : memref<80x256xf32, #tpu.memory_space<vmem>>, vector<32x256xf32>
    %58 = arith.maximumf %56, %57 : vector<32x256xf32>
    %59 = vector.extract_strided_slice %58 {offsets = [0, 0], sizes = [32, 128], strides = [1, 1]} : vector<32x256xf32> to vector<32x128xf32>
    %60 = vector.extract_strided_slice %58 {offsets = [0, 128], sizes = [32, 128], strides = [1, 1]} : vector<32x256xf32> to vector<32x128xf32>
    %61 = arith.maximumf %59, %60 : vector<32x128xf32>
    %cst_61 = arith.constant 0.000000e+00 : f32
    %62 = vector.broadcast %cst_61 : f32 to vector<32x128xf32>
    %63 = arith.maximumf %61, %62 : vector<32x128xf32>
    %c40_62 = arith.constant 40 : index
    %c0_63 = arith.constant 0 : index
    %64 = vector.load %arg14[%c40_62, %c0_63] : memref<80x128xf32, #tpu.memory_space<vmem>>, vector<32x128xf32>
    tpu.vector_store %arg14[%c40_62, %c0_63], %63 {strides = array<i32>} : memref<80x128xf32, #tpu.memory_space<vmem>>, vector<32x128xf32>,
    %c0_64 = arith.constant 0 : index
    %c0_65 = arith.constant 0 : index
    %65 = vector.load %arg14[%c0_64, %c0_65] : memref<80x128xf32, #tpu.memory_space<vmem>>, vector<72x128xf32>
    %66 = arith.truncf %65 : vector<72x128xf32> to vector<72x128xbf16>
    %c0_66 = arith.constant 0 : index
    %c0_67 = arith.constant 0 : index
    %c0_68 = arith.constant 0 : index
    %67 = vector.load %arg4[%c0_66, %c0_67, %c0_68] : memref<5x128x256xbf16, #tpu.memory_space<vmem>>, vector<1x128x256xbf16>
    %68 = vector.shape_cast %67 : vector<1x128x256xbf16> to vector<128x256xbf16>
    %cst_69 = arith.constant dense<0.000000e+00> : vector<72x256xf32>
    %69 = tpu.matmul %66, %68, %cst_69 {dimension_numbers = #tpu.dot_dimension_numbers<[1], [0], [0], [1], [0, 0, 1, 1], [], []>} : vector<72x128xbf16>, vector<128x256xbf16>, vector<72x256xf32> -> vector<72x256xf32>
    %c0_70 = arith.constant 0 : index
    %c0_71 = arith.constant 0 : index
    %70 = vector.load %arg5[%c0_70, %c0_71] : memref<1x256xf32, #tpu.memory_space<vmem>>, vector<1x256xf32>
    %71 = vector.broadcast %70 : vector<1x256xf32> to vector<72x256xf32>
    %72 = arith.addf %69, %71 : vector<72x256xf32>
    %c0_72 = arith.constant 0 : index
    %c0_73 = arith.constant 0 : index
    %73 = vector.load %arg15[%c0_72, %c0_73] : memref<80x256xf32, #tpu.memory_space<vmem>>, vector<72x256xf32>
    tpu.vector_store %arg15[%c0_72, %c0_73], %72 {strides = array<i32>} : memref<80x256xf32, #tpu.memory_space<vmem>>, vector<72x256xf32>,
    %c2_74 = arith.constant 2 : index
    %c0_75 = arith.constant 0 : index
    %74 = vector.load %arg14[%c2_74, %c0_75] : memref<80x128xf32, #tpu.memory_space<vmem>>, vector<72x128xf32>
    %75 = arith.truncf %74 : vector<72x128xf32> to vector<72x128xbf16>
    %c1_76 = arith.constant 1 : index
    %c0_77 = arith.constant 0 : index
    %c0_78 = arith.constant 0 : index
    %76 = vector.load %arg4[%c1_76, %c0_77, %c0_78] : memref<5x128x256xbf16, #tpu.memory_space<vmem>>, vector<1x128x256xbf16>
    %77 = vector.shape_cast %76 : vector<1x128x256xbf16> to vector<128x256xbf16>
    %cst_79 = arith.constant dense<0.000000e+00> : vector<72x256xf32>
    %78 = tpu.matmul %75, %77, %cst_79 {dimension_numbers = #tpu.dot_dimension_numbers<[1], [0], [0], [1], [0, 0, 1, 1], [], []>} : vector<72x128xbf16>, vector<128x256xbf16>, vector<72x256xf32> -> vector<72x256xf32>
    %c0_80 = arith.constant 0 : index
    %c0_81 = arith.constant 0 : index
    %79 = vector.load %arg15[%c0_80, %c0_81] : memref<80x256xf32, #tpu.memory_space<vmem>>, vector<72x256xf32>
    %80 = arith.addf %79, %78 : vector<72x256xf32>
    %c0_82 = arith.constant 0 : index
    %c0_83 = arith.constant 0 : index
    %81 = vector.load %arg15[%c0_82, %c0_83] : memref<80x256xf32, #tpu.memory_space<vmem>>, vector<72x256xf32>
    tpu.vector_store %arg15[%c0_82, %c0_83], %80 {strides = array<i32>} : memref<80x256xf32, #tpu.memory_space<vmem>>, vector<72x256xf32>,
    %c4_84 = arith.constant 4 : index
    %c0_85 = arith.constant 0 : index
    %82 = vector.load %arg14[%c4_84, %c0_85] : memref<80x128xf32, #tpu.memory_space<vmem>>, vector<72x128xf32>
    %83 = arith.truncf %82 : vector<72x128xf32> to vector<72x128xbf16>
    %c2_86 = arith.constant 2 : index
    %c0_87 = arith.constant 0 : index
    %c0_88 = arith.constant 0 : index
    %84 = vector.load %arg4[%c2_86, %c0_87, %c0_88] : memref<5x128x256xbf16, #tpu.memory_space<vmem>>, vector<1x128x256xbf16>
    %85 = vector.shape_cast %84 : vector<1x128x256xbf16> to vector<128x256xbf16>
    %cst_89 = arith.constant dense<0.000000e+00> : vector<72x256xf32>
    %86 = tpu.matmul %83, %85, %cst_89 {dimension_numbers = #tpu.dot_dimension_numbers<[1], [0], [0], [1], [0, 0, 1, 1], [], []>} : vector<72x128xbf16>, vector<128x256xbf16>, vector<72x256xf32> -> vector<72x256xf32>
    %c0_90 = arith.constant 0 : index
    %c0_91 = arith.constant 0 : index
    %87 = vector.load %arg15[%c0_90, %c0_91] : memref<80x256xf32, #tpu.memory_space<vmem>>, vector<72x256xf32>
    %88 = arith.addf %87, %86 : vector<72x256xf32>
    %c0_92 = arith.constant 0 : index
    %c0_93 = arith.constant 0 : index
    %89 = vector.load %arg15[%c0_92, %c0_93] : memref<80x256xf32, #tpu.memory_space<vmem>>, vector<72x256xf32>
    tpu.vector_store %arg15[%c0_92, %c0_93], %88 {strides = array<i32>} : memref<80x256xf32, #tpu.memory_space<vmem>>, vector<72x256xf32>,
    %c6 = arith.constant 6 : index
    %c0_94 = arith.constant 0 : index
    %90 = vector.load %arg14[%c6, %c0_94] : memref<80x128xf32, #tpu.memory_space<vmem>>, vector<72x128xf32>
    %91 = arith.truncf %90 : vector<72x128xf32> to vector<72x128xbf16>
    %c3_95 = arith.constant 3 : index
    %c0_96 = arith.constant 0 : index
    %c0_97 = arith.constant 0 : index
    %92 = vector.load %arg4[%c3_95, %c0_96, %c0_97] : memref<5x128x256xbf16, #tpu.memory_space<vmem>>, vector<1x128x256xbf16>
    %93 = vector.shape_cast %92 : vector<1x128x256xbf16> to vector<128x256xbf16>
    %cst_98 = arith.constant dense<0.000000e+00> : vector<72x256xf32>
    %94 = tpu.matmul %91, %93, %cst_98 {dimension_numbers = #tpu.dot_dimension_numbers<[1], [0], [0], [1], [0, 0, 1, 1], [], []>} : vector<72x128xbf16>, vector<128x256xbf16>, vector<72x256xf32> -> vector<72x256xf32>
    %c0_99 = arith.constant 0 : index
    %c0_100 = arith.constant 0 : index
    %95 = vector.load %arg15[%c0_99, %c0_100] : memref<80x256xf32, #tpu.memory_space<vmem>>, vector<72x256xf32>
    %96 = arith.addf %95, %94 : vector<72x256xf32>
    %c0_101 = arith.constant 0 : index
    %c0_102 = arith.constant 0 : index
    %97 = vector.load %arg15[%c0_101, %c0_102] : memref<80x256xf32, #tpu.memory_space<vmem>>, vector<72x256xf32>
    tpu.vector_store %arg15[%c0_101, %c0_102], %96 {strides = array<i32>} : memref<80x256xf32, #tpu.memory_space<vmem>>, vector<72x256xf32>,
    %c8 = arith.constant 8 : index
    %c0_103 = arith.constant 0 : index
    %98 = vector.load %arg14[%c8, %c0_103] : memref<80x128xf32, #tpu.memory_space<vmem>>, vector<72x128xf32>
    %99 = arith.truncf %98 : vector<72x128xf32> to vector<72x128xbf16>
    %c4_104 = arith.constant 4 : index
    %c0_105 = arith.constant 0 : index
    %c0_106 = arith.constant 0 : index
    %100 = vector.load %arg4[%c4_104, %c0_105, %c0_106] : memref<5x128x256xbf16, #tpu.memory_space<vmem>>, vector<1x128x256xbf16>
    %101 = vector.shape_cast %100 : vector<1x128x256xbf16> to vector<128x256xbf16>
    %cst_107 = arith.constant dense<0.000000e+00> : vector<72x256xf32>
    %102 = tpu.matmul %99, %101, %cst_107 {dimension_numbers = #tpu.dot_dimension_numbers<[1], [0], [0], [1], [0, 0, 1, 1], [], []>} : vector<72x128xbf16>, vector<128x256xbf16>, vector<72x256xf32> -> vector<72x256xf32>
    %c0_108 = arith.constant 0 : index
    %c0_109 = arith.constant 0 : index
    %103 = vector.load %arg15[%c0_108, %c0_109] : memref<80x256xf32, #tpu.memory_space<vmem>>, vector<72x256xf32>
    %104 = arith.addf %103, %102 : vector<72x256xf32>
    %c0_110 = arith.constant 0 : index
    %c0_111 = arith.constant 0 : index
    %105 = vector.load %arg15[%c0_110, %c0_111] : memref<80x256xf32, #tpu.memory_space<vmem>>, vector<72x256xf32>
    tpu.vector_store %arg15[%c0_110, %c0_111], %104 {strides = array<i32>} : memref<80x256xf32, #tpu.memory_space<vmem>>, vector<72x256xf32>,
    %c0_112 = arith.constant 0 : index
    %c0_113 = arith.constant 0 : index
    %106 = vector.load %arg15[%c0_112, %c0_113] : memref<80x256xf32, #tpu.memory_space<vmem>>, vector<32x256xf32>
    %c2_114 = arith.constant 2 : index
    %c0_115 = arith.constant 0 : index
    %107 = vector.load %arg15[%c2_114, %c0_115] : memref<80x256xf32, #tpu.memory_space<vmem>>, vector<32x256xf32>
    %108 = arith.maximumf %106, %107 : vector<32x256xf32>
    %109 = vector.extract_strided_slice %108 {offsets = [0, 0], sizes = [32, 128], strides = [1, 1]} : vector<32x256xf32> to vector<32x128xf32>
    %110 = vector.extract_strided_slice %108 {offsets = [0, 128], sizes = [32, 128], strides = [1, 1]} : vector<32x256xf32> to vector<32x128xf32>
    %111 = arith.maximumf %109, %110 : vector<32x128xf32>
    %cst_116 = arith.constant 0.000000e+00 : f32
    %112 = vector.broadcast %cst_116 : f32 to vector<32x128xf32>
    %113 = arith.maximumf %111, %112 : vector<32x128xf32>
    %c0_117 = arith.constant 0 : index
    %c0_118 = arith.constant 0 : index
    %114 = vector.load %arg16[%c0_117, %c0_118] : memref<80x128xf32, #tpu.memory_space<vmem>>, vector<32x128xf32>
    tpu.vector_store %arg16[%c0_117, %c0_118], %113 {strides = array<i32>} : memref<80x128xf32, #tpu.memory_space<vmem>>, vector<32x128xf32>,
    %c40_119 = arith.constant 40 : index
    %c0_120 = arith.constant 0 : index
    %115 = vector.load %arg15[%c40_119, %c0_120] : memref<80x256xf32, #tpu.memory_space<vmem>>, vector<32x256xf32>
    %c42 = arith.constant 42 : index
    %c0_121 = arith.constant 0 : index
    %116 = vector.load %arg15[%c42, %c0_121] : memref<80x256xf32, #tpu.memory_space<vmem>>, vector<32x256xf32>
    %117 = arith.maximumf %115, %116 : vector<32x256xf32>
    %118 = vector.extract_strided_slice %117 {offsets = [0, 0], sizes = [32, 128], strides = [1, 1]} : vector<32x256xf32> to vector<32x128xf32>
    %119 = vector.extract_strided_slice %117 {offsets = [0, 128], sizes = [32, 128], strides = [1, 1]} : vector<32x256xf32> to vector<32x128xf32>
    %120 = arith.maximumf %118, %119 : vector<32x128xf32>
    %cst_122 = arith.constant 0.000000e+00 : f32
    %121 = vector.broadcast %cst_122 : f32 to vector<32x128xf32>
    %122 = arith.maximumf %120, %121 : vector<32x128xf32>
    %c40_123 = arith.constant 40 : index
    %c0_124 = arith.constant 0 : index
    %123 = vector.load %arg16[%c40_123, %c0_124] : memref<80x128xf32, #tpu.memory_space<vmem>>, vector<32x128xf32>
    tpu.vector_store %arg16[%c40_123, %c0_124], %122 {strides = array<i32>} : memref<80x128xf32, #tpu.memory_space<vmem>>, vector<32x128xf32>,
    %c0_125 = arith.constant 0 : index
    %c0_126 = arith.constant 0 : index
    %124 = vector.load %arg7[%c0_125, %c0_126] : memref<1x120xf32, #tpu.memory_space<vmem>>, vector<1x120xf32>
    %125 = vector.shape_cast %124 : vector<1x120xf32> to vector<1x120xf32>
    %126 = vector.broadcast %125 : vector<1x120xf32> to vector<2x120xf32>
    %c0_127 = arith.constant 0 : index
    %c0_128 = arith.constant 0 : index
    %127 = vector.load %arg16[%c0_127, %c0_128] : memref<80x128xf32, #tpu.memory_space<vmem>>, vector<1x128xf32>
    %c40_129 = arith.constant 40 : index
    %c0_130 = arith.constant 0 : index
    %128 = vector.load %arg16[%c40_129, %c0_130] : memref<80x128xf32, #tpu.memory_space<vmem>>, vector<1x128xf32>
    %129 = tpu.concatenate %127, %128 in 0 : vector<1x128xf32>, vector<1x128xf32> -> vector<2x128xf32>
    %c0_131 = arith.constant 0 : index
    %c0_132 = arith.constant 0 : index
    %c0_133 = arith.constant 0 : index
    %130 = vector.load %arg6[%c0_131, %c0_132, %c0_133] : memref<5x128x120xf32, #tpu.memory_space<vmem>>, vector<1x128x120xf32>
    %131 = vector.shape_cast %130 : vector<1x128x120xf32> to vector<128x120xf32>
    %cst_134 = arith.constant dense<0.000000e+00> : vector<2x120xf32>
    %132 = tpu.matmul %129, %131, %cst_134 {dimension_numbers = #tpu.dot_dimension_numbers<[1], [0], [0], [1], [0, 0, 1, 1], [], []>} : vector<2x128xf32>, vector<128x120xf32>, vector<2x120xf32> -> vector<2x120xf32>
    %133 = arith.addf %126, %132 : vector<2x120xf32>
    %c4_135 = arith.constant 4 : index
    %c0_136 = arith.constant 0 : index
    %134 = vector.load %arg16[%c4_135, %c0_136] : memref<80x128xf32, #tpu.memory_space<vmem>>, vector<1x128xf32>
    %c44 = arith.constant 44 : index
    %c0_137 = arith.constant 0 : index
    %135 = vector.load %arg16[%c44, %c0_137] : memref<80x128xf32, #tpu.memory_space<vmem>>, vector<1x128xf32>
    %136 = tpu.concatenate %134, %135 in 0 : vector<1x128xf32>, vector<1x128xf32> -> vector<2x128xf32>
    %c1_138 = arith.constant 1 : index
    %c0_139 = arith.constant 0 : index
    %c0_140 = arith.constant 0 : index
    %137 = vector.load %arg6[%c1_138, %c0_139, %c0_140] : memref<5x128x120xf32, #tpu.memory_space<vmem>>, vector<1x128x120xf32>
    %138 = vector.shape_cast %137 : vector<1x128x120xf32> to vector<128x120xf32>
    %cst_141 = arith.constant dense<0.000000e+00> : vector<2x120xf32>
    %139 = tpu.matmul %136, %138, %cst_141 {dimension_numbers = #tpu.dot_dimension_numbers<[1], [0], [0], [1], [0, 0, 1, 1], [], []>} : vector<2x128xf32>, vector<128x120xf32>, vector<2x120xf32> -> vector<2x120xf32>
    %140 = arith.addf %133, %139 : vector<2x120xf32>
    %c8_142 = arith.constant 8 : index
    %c0_143 = arith.constant 0 : index
    %141 = vector.load %arg16[%c8_142, %c0_143] : memref<80x128xf32, #tpu.memory_space<vmem>>, vector<1x128xf32>
    %c48 = arith.constant 48 : index
    %c0_144 = arith.constant 0 : index
    %142 = vector.load %arg16[%c48, %c0_144] : memref<80x128xf32, #tpu.memory_space<vmem>>, vector<1x128xf32>
    %143 = tpu.concatenate %141, %142 in 0 : vector<1x128xf32>, vector<1x128xf32> -> vector<2x128xf32>
    %c2_145 = arith.constant 2 : index
    %c0_146 = arith.constant 0 : index
    %c0_147 = arith.constant 0 : index
    %144 = vector.load %arg6[%c2_145, %c0_146, %c0_147] : memref<5x128x120xf32, #tpu.memory_space<vmem>>, vector<1x128x120xf32>
    %145 = vector.shape_cast %144 : vector<1x128x120xf32> to vector<128x120xf32>
    %cst_148 = arith.constant dense<0.000000e+00> : vector<2x120xf32>
    %146 = tpu.matmul %143, %145, %cst_148 {dimension_numbers = #tpu.dot_dimension_numbers<[1], [0], [0], [1], [0, 0, 1, 1], [], []>} : vector<2x128xf32>, vector<128x120xf32>, vector<2x120xf32> -> vector<2x120xf32>
    %147 = arith.addf %140, %146 : vector<2x120xf32>
    %c12 = arith.constant 12 : index
    %c0_149 = arith.constant 0 : index
    %148 = vector.load %arg16[%c12, %c0_149] : memref<80x128xf32, #tpu.memory_space<vmem>>, vector<1x128xf32>
    %c52 = arith.constant 52 : index
    %c0_150 = arith.constant 0 : index
    %149 = vector.load %arg16[%c52, %c0_150] : memref<80x128xf32, #tpu.memory_space<vmem>>, vector<1x128xf32>
    %150 = tpu.concatenate %148, %149 in 0 : vector<1x128xf32>, vector<1x128xf32> -> vector<2x128xf32>
    %c3_151 = arith.constant 3 : index
    %c0_152 = arith.constant 0 : index
    %c0_153 = arith.constant 0 : index
    %151 = vector.load %arg6[%c3_151, %c0_152, %c0_153] : memref<5x128x120xf32, #tpu.memory_space<vmem>>, vector<1x128x120xf32>
    %152 = vector.shape_cast %151 : vector<1x128x120xf32> to vector<128x120xf32>
    %cst_154 = arith.constant dense<0.000000e+00> : vector<2x120xf32>
    %153 = tpu.matmul %150, %152, %cst_154 {dimension_numbers = #tpu.dot_dimension_numbers<[1], [0], [0], [1], [0, 0, 1, 1], [], []>} : vector<2x128xf32>, vector<128x120xf32>, vector<2x120xf32> -> vector<2x120xf32>
    %154 = arith.addf %147, %153 : vector<2x120xf32>
    %c16 = arith.constant 16 : index
    %c0_155 = arith.constant 0 : index
    %155 = vector.load %arg16[%c16, %c0_155] : memref<80x128xf32, #tpu.memory_space<vmem>>, vector<1x128xf32>
    %c56 = arith.constant 56 : index
    %c0_156 = arith.constant 0 : index
    %156 = vector.load %arg16[%c56, %c0_156] : memref<80x128xf32, #tpu.memory_space<vmem>>, vector<1x128xf32>
    %157 = tpu.concatenate %155, %156 in 0 : vector<1x128xf32>, vector<1x128xf32> -> vector<2x128xf32>
    %c4_157 = arith.constant 4 : index
    %c0_158 = arith.constant 0 : index
    %c0_159 = arith.constant 0 : index
    %158 = vector.load %arg6[%c4_157, %c0_158, %c0_159] : memref<5x128x120xf32, #tpu.memory_space<vmem>>, vector<1x128x120xf32>
    %159 = vector.shape_cast %158 : vector<1x128x120xf32> to vector<128x120xf32>
    %cst_160 = arith.constant dense<0.000000e+00> : vector<2x120xf32>
    %160 = tpu.matmul %157, %159, %cst_160 {dimension_numbers = #tpu.dot_dimension_numbers<[1], [0], [0], [1], [0, 0, 1, 1], [], []>} : vector<2x128xf32>, vector<128x120xf32>, vector<2x120xf32> -> vector<2x120xf32>
    %161 = arith.addf %154, %160 : vector<2x120xf32>
    %cst_161 = arith.constant 0.000000e+00 : f32
    %162 = vector.broadcast %cst_161 : f32 to vector<2x120xf32>
    %163 = arith.maximumf %161, %162 : vector<2x120xf32>
    %c0_162 = arith.constant 0 : index
    %c0_163 = arith.constant 0 : index
    %164 = vector.load %arg8[%c0_162, %c0_163] : memref<120x84xf32, #tpu.memory_space<vmem>>, vector<120x84xf32>
    %cst_164 = arith.constant dense<0.000000e+00> : vector<2x84xf32>
    %165 = tpu.matmul %163, %164, %cst_164 {dimension_numbers = #tpu.dot_dimension_numbers<[1], [0], [0], [1], [0, 0, 1, 1], [], []>} : vector<2x120xf32>, vector<120x84xf32>, vector<2x84xf32> -> vector<2x84xf32>
    %c0_165 = arith.constant 0 : index
    %c0_166 = arith.constant 0 : index
    %166 = vector.load %arg9[%c0_165, %c0_166] : memref<1x84xf32, #tpu.memory_space<vmem>>, vector<1x84xf32>
    %167 = vector.broadcast %166 : vector<1x84xf32> to vector<2x84xf32>
    %168 = arith.addf %165, %167 : vector<2x84xf32>
    %cst_167 = arith.constant 0.000000e+00 : f32
    %169 = vector.broadcast %cst_167 : f32 to vector<2x84xf32>
    %170 = arith.maximumf %168, %169 : vector<2x84xf32>
    %c0_168 = arith.constant 0 : index
    %c0_169 = arith.constant 0 : index
    %171 = vector.load %arg10[%c0_168, %c0_169] : memref<84x10xf32, #tpu.memory_space<vmem>>, vector<84x10xf32>
    %cst_170 = arith.constant dense<0.000000e+00> : vector<2x10xf32>
    %172 = tpu.matmul %170, %171, %cst_170 {dimension_numbers = #tpu.dot_dimension_numbers<[1], [0], [0], [1], [0, 0, 1, 1], [], []>} : vector<2x84xf32>, vector<84x10xf32>, vector<2x10xf32> -> vector<2x10xf32>
    %c0_171 = arith.constant 0 : index
    %c0_172 = arith.constant 0 : index
    %173 = vector.load %arg11[%c0_171, %c0_172] : memref<1x10xf32, #tpu.memory_space<vmem>>, vector<1x10xf32>
    %174 = vector.broadcast %173 : vector<1x10xf32> to vector<2x10xf32>
    %175 = arith.addf %172, %174 : vector<2x10xf32>
    %cst_173 = arith.constant 0.000000e+00 : f32
    %176 = vector.broadcast %cst_173 : f32 to vector<8x128xf32>
    %c0_174 = arith.constant 0 : index
    %c0_175 = arith.constant 0 : index
    %177 = vector.load %arg12[%c0_174, %c0_175] : memref<8x128xf32, #tpu.memory_space<vmem>>, vector<8x128xf32>
    tpu.vector_store %arg12[%c0_174, %c0_175], %176 {strides = array<i32>} : memref<8x128xf32, #tpu.memory_space<vmem>>, vector<8x128xf32>,
    %c0_176 = arith.constant 0 : index
    %c0_177 = arith.constant 0 : index
    %178 = vector.load %arg12[%c0_176, %c0_177] : memref<8x128xf32, #tpu.memory_space<vmem>>, vector<2x10xf32>
    tpu.vector_store %arg12[%c0_176, %c0_177], %175 {strides = array<i32>} : memref<8x128xf32, #tpu.memory_space<vmem>>, vector<2x10xf32>,
    return
  }
  func.func @transform_0(%arg0: i32) -> (i32, i32) {
    %c0_i32 = arith.constant 0 : i32
    %c0_i32_0 = arith.constant 0 : i32
    return %arg0, %c0_i32 : i32, i32
  }
  func.func @transform_1(%arg0: i32) -> (i32, i32, i32) {
    %c0_i32 = arith.constant 0 : i32
    %c0_i32_0 = arith.constant 0 : i32
    %c0_i32_1 = arith.constant 0 : i32
    %c0_i32_2 = arith.constant 0 : i32
    return %c0_i32, %c0_i32_0, %c0_i32_1 : i32, i32, i32
  }
  func.func @transform_2(%arg0: i32) -> (i32, i32) {
    %c0_i32 = arith.constant 0 : i32
    %c0_i32_0 = arith.constant 0 : i32
    %c0_i32_1 = arith.constant 0 : i32
    return %c0_i32, %c0_i32_0 : i32, i32
  }
  func.func @transform_3(%arg0: i32) -> (i32, i32, i32) {
    %c0_i32 = arith.constant 0 : i32
    %c0_i32_0 = arith.constant 0 : i32
    %c0_i32_1 = arith.constant 0 : i32
    %c0_i32_2 = arith.constant 0 : i32
    return %c0_i32, %c0_i32_0, %c0_i32_1 : i32, i32, i32
  }
  func.func @transform_4(%arg0: i32) -> (i32, i32) {
    %c0_i32 = arith.constant 0 : i32
    %c0_i32_0 = arith.constant 0 : i32
    %c0_i32_1 = arith.constant 0 : i32
    return %c0_i32, %c0_i32_0 : i32, i32
  }
  func.func @transform_5(%arg0: i32) -> (i32, i32, i32) {
    %c0_i32 = arith.constant 0 : i32
    %c0_i32_0 = arith.constant 0 : i32
    %c0_i32_1 = arith.constant 0 : i32
    %c0_i32_2 = arith.constant 0 : i32
    return %c0_i32, %c0_i32_0, %c0_i32_1 : i32, i32, i32
  }
  func.func @transform_6(%arg0: i32) -> (i32, i32) {
    %c0_i32 = arith.constant 0 : i32
    %c0_i32_0 = arith.constant 0 : i32
    %c0_i32_1 = arith.constant 0 : i32
    return %c0_i32, %c0_i32_0 : i32, i32
  }
  func.func @transform_7(%arg0: i32) -> (i32, i32) {
    %c0_i32 = arith.constant 0 : i32
    %c0_i32_0 = arith.constant 0 : i32
    %c0_i32_1 = arith.constant 0 : i32
    return %c0_i32, %c0_i32_0 : i32, i32
  }
  func.func @transform_8(%arg0: i32) -> (i32, i32) {
    %c0_i32 = arith.constant 0 : i32
    %c0_i32_0 = arith.constant 0 : i32
    %c0_i32_1 = arith.constant 0 : i32
    return %c0_i32, %c0_i32_0 : i32, i32
  }
  func.func @transform_9(%arg0: i32) -> (i32, i32) {
    %c0_i32 = arith.constant 0 : i32
    %c0_i32_0 = arith.constant 0 : i32
    %c0_i32_1 = arith.constant 0 : i32
    return %c0_i32, %c0_i32_0 : i32, i32
  }
  func.func @transform_10(%arg0: i32) -> (i32, i32) {
    %c0_i32 = arith.constant 0 : i32
    %c0_i32_0 = arith.constant 0 : i32
    %c0_i32_1 = arith.constant 0 : i32
    return %c0_i32, %c0_i32_0 : i32, i32
  }
  func.func @transform_11(%arg0: i32) -> (i32, i32) {
    %c0_i32 = arith.constant 0 : i32
    %c0_i32_0 = arith.constant 0 : i32
    return %arg0, %c0_i32 : i32, i32
  }
}

</mosaic_0001>

<bundles_post_ra>
// kernel: lenet_apply.1
= control target key start
LH: loop header
LB: loop body
LE: loop exit
PB: predicated region body
PF: predicated region fallthrough
CT: control target
= control target key end

     0   :  { %v4798_v1 = vmov 0   ;;  %vm1271_vm0 = vcmask 1046528   ;;  %vm4801_vm1 = vmmov 0   ;;  %vm2619_vm2 = vcmask 1045504   ;;  %s6107_s1 = inlined_call_operand.vmem [shape: bf16[5,128,256], index: 1, kind: input, shape index: {}]   ;;  %s6108_s0 = inlined_call_operand.vmem [shape: f32[80,128], index: 0, kind: input, shape index: {}]   ;;  %s6109_s4 = inlined_call_operand.vmem [shape: f32[1,256], index: 4, kind: input, shape index: {}]   ;;  %s6110_s3 = inlined_call_operand.vmem [shape: bf16[5,128,256], index: 3, kind: input, shape index: {}]   ;;  %s6111_s2 = inlined_call_operand.vmem [shape: f32[1,256], index: 2, kind: input, shape index: {}]   ;;  %s6112_s5 = inlined_call_operand.vmem [shape: f32[5,128,120], index: 5, kind: input, shape index: {}]   ;;  %s6113_s7 = inlined_call_operand.vmem [shape: f32[120,84], index: 7, kind: input, shape index: {}]   ;;  %s6114_s6 = inlined_call_operand.vmem [shape: f32[1,120], index: 6, kind: input, shape index: {}]   ;;  %s6115_s9 = inlined_call_operand.vmem [shape: f32[84,10], index: 9, kind: input, shape index: {}]   ;;  %s6116_s11 = inlined_call_operand.vmem [shape: f32[8,128], index: 11, kind: output, shape index: {}]   ;;  %s6117_s8 = inlined_call_operand.vmem [shape: f32[1,84], index: 8, kind: input, shape index: {}]   ;;  %s6118_s10 = inlined_call_operand.vmem [shape: f32[1,10], index: 10, kind: input, shape index: {}]  }
   0x1   :  { %v4557_v0 = vld [vmem:[%s6107_s1 + $0x84] ss:$8 sps:$4 sm:$0xff]   ;;  %408 = vmatprep.mubr.bf16.mxu0 %v4798_v1  ;;  %198 = vmatprep.mubr.bf16.mxu1 %v4798_v1  ;;  %v4559_v2 = vld [vmem:[%s6107_s1 + $0x80] ss:$8 sps:$4 sm:$0xff]   ;;  %v4560_v3 = vld [vmem:[%s6107_s1 + $0x94] ss:$8 sps:$4 sm:$0xff]  }
   0x2   :  { %376 = vmatprep.subr.bf16.mxu0 %v4557_v0  ;;  %v4562_v4 = vld [vmem:[%s6107_s1 + $0x90] ss:$8 sps:$4 sm:$0xff]   ;;  %v4563_v5 = vld [vmem:[%s6107_s1 + $0xa4] ss:$8 sps:$4 sm:$0xff]   ;;  %v4565_v6 = vld [vmem:[%s6107_s1 + $0xa0] ss:$8 sps:$4 sm:$0xff]  }
   0x3   :  { %377 = vmatpush1.bf16.msra.mxu0 %v4559_v2  ;;  %v4566_v7 = vld [vmem:[%s6107_s1 + $0xb4] ss:$8 sps:$4 sm:$0xff]   ;;  %v4568_v8 = vld [vmem:[%s6107_s1 + $0xb0] ss:$8 sps:$4 sm:$0xff]   ;;  %v4569_v9 = vld [vmem:[%s6107_s1 + $0xc4] ss:$8 sps:$4 sm:$0xff]  }
   0x4   :  { %378 = vmatprep.subr.bf16.mxu0 %v4560_v3  ;;  %v4571_v10 = vld [vmem:[%s6107_s1 + $0xc0] ss:$8 sps:$4 sm:$0xff]   ;;  %v4572_v11 = vld [vmem:[%s6107_s1 + $0xd4] ss:$8 sps:$4 sm:$0xff]   ;;  %v4574_v12 = vld [vmem:[%s6107_s1 + $0xd0] ss:$8 sps:$4 sm:$0xff]  }
   0x5   :  { %v4575_v13 = vld [vmem:[%s6107_s1 + $0xe4] ss:$8 sps:$4 sm:$0xff]   ;;  %v4577_v14 = vld [vmem:[%s6107_s1 + $0xe0] ss:$8 sps:$4 sm:$0xff]   ;;  %v4578_v15 = vld [vmem:[%s6107_s1 + $0xf4] ss:$8 sps:$4 sm:$0xff]  }
   0x6   :  { %v4580_v16 = vld [vmem:[%s6107_s1 + $0xf0] ss:$8 sps:$4 sm:$0xff]   ;;  %v265_v17 = vld [vmem:[%s6108_s0 + $0x1] sm:$0xff]  ;;  %v4586_v22 = vld [vmem:[%s6107_s1 + $0x114] ss:$8 sps:$4 sm:$0xff]   ;;  %vm2752_vm3 = vcmask 1040384  }
   0x7   :  { %379 = vmatpush1.bf16.msra.mxu0 %v4562_v4  ;;  %v266_v18 = vld [vmem:[%s6108_s0 + $0x9] sm:$0xff]  ;;  %v267_v24 = vld [vmem:[%s6108_s0 + $0x11] sm:$0xff]  ;;  %v268_v25 = vld [vmem:[%s6108_s0 + $0x19] sm:$0xff]  ;;  %vm3240_vm4 = vcmask 982016   ;;  %vm3337_vm5 = vcmask 1043456   ;;  %vm3333_vm6 = vcmask 687104  }
   0x8   :  { %380 = vmatprep.subr.bf16.mxu0 %v4563_v5  ;;  %v4583_v19 = vld [vmem:[%s6107_s1 + $0x104] ss:$8 sps:$4 sm:$0xff]   ;;  %v274_v20 = vpack.c.bf16 %v266_v18, %v265_v17  ;;  %v4581_v21 = vld [vmem:[%s6107_s1 + $0x100] ss:$8 sps:$4 sm:$0xff]   ;;  %v4584_v23 = vld [vmem:[%s6107_s1 + $0x110] ss:$8 sps:$4 sm:$0xff]   ;;  %v275_v28 = vpack.c.bf16 %v268_v25, %v267_v24 }
   0x9   :  { %v4589_v26 = vld [vmem:[%s6107_s1 + $0x124] ss:$8 sps:$4 sm:$0xff]   ;;  %v4587_v27 = vld [vmem:[%s6107_s1 + $0x120] ss:$8 sps:$4 sm:$0xff]   ;;  %v4592_v31 = vld [vmem:[%s6107_s1 + $0x134] ss:$8 sps:$4 sm:$0xff]  }
   0xa   :  { %v4629_v29 = vld [vmem:[%s6107_s1 + $0x4] ss:$8 sps:$4 sm:$0xff]   ;;  %v4631_v30 = vld [vmem:[%s6107_s1] ss:$8 sps:$4 sm:$0xff]   ;;  %v4632_v32 = vld [vmem:[%s6107_s1 + $0x14] ss:$8 sps:$4 sm:$0xff]  }
   0xb   :  { %381 = vmatpush1.bf16.msra.mxu0 %v4565_v6  ;;  %166 = vmatprep.subr.bf16.mxu1 %v4629_v29  ;;  %v4590_v33 = vld [vmem:[%s6107_s1 + $0x130] ss:$8 sps:$4 sm:$0xff]   ;;  %v269_v34 = vld [vmem:[%s6108_s0 + $0x21] sm:$0xff]  ;;  %v4644_v41 = vld [vmem:[%s6107_s1 + $0x34] ss:$8 sps:$4 sm:$0xff]   ;;  %vm3412_vm7 = vcmask 74752  }
   0xc   :  { %382 = vmatprep.subr.bf16.mxu0 %v4566_v7  ;;  %167 = vmatpush1.bf16.msra.mxu1 %v4631_v30  ;;  %v4637_v35 = vld [vmem:[%s6107_s1 + $0x10] ss:$8 sps:$4 sm:$0xff]   ;;  %v4638_v37 = vld [vmem:[%s6107_s1 + $0x24] ss:$8 sps:$4 sm:$0xff]   ;;  %v4640_v39 = vld [vmem:[%s6107_s1 + $0x20] ss:$8 sps:$4 sm:$0xff]  }
   0xd   :  { %168 = vmatprep.subr.bf16.mxu1 %v4632_v32  ;;  %v270_v36 = vld [vmem:[%s6108_s0 + $0x29] sm:$0xff]  ;;  %v4598_v43 = vld [vmem:[%s6107_s1 + $0x154] ss:$8 sps:$4 sm:$0xff]   ;;  %v273_v57 = vld [vmem:[%s6108_s0 + $0x41] sm:$0xff] }
   0xe   :  { %v4595_v38 = vld [vmem:[%s6107_s1 + $0x144] ss:$8 sps:$4 sm:$0xff]   ;;  %v276_v40 = vpack.c.bf16 %v270_v36, %v269_v34  ;;  %v4593_v42 = vld [vmem:[%s6107_s1 + $0x140] ss:$8 sps:$4 sm:$0xff]   ;;  %v271_v44 = vld [vmem:[%s6108_s0 + $0x31] sm:$0xff]  ;;  %v278_v61 = vpack.c.bf16 %v273_v57, %v273_v57 }
   0xf   :  { %383 = vmatpush1.bf16.msra.mxu0 %v4568_v8  ;;  %v272_v45 = vld [vmem:[%s6108_s0 + $0x39] sm:$0xff]  ;;  %v4650_v47 = vld [vmem:[%s6107_s1 + $0x44] ss:$8 sps:$4 sm:$0xff]   ;;  %v50_v29 = vld [vmem:[%s6108_s0 + $0x30] sm:$0xff] }
  0x10   :  { %384 = vmatprep.subr.bf16.mxu0 %v4569_v9  ;;  %169 = vmatpush1.bf16.msra.mxu1 %v4637_v35  ;;  %v4646_v46 = vld [vmem:[%s6107_s1 + $0x30] ss:$8 sps:$4 sm:$0xff]   ;;  %v4601_v49 = vld [vmem:[%s6107_s1 + $0x164] ss:$8 sps:$4 sm:$0xff]   ;;  %v4652_v50 = vld [vmem:[%s6107_s1 + $0x40] ss:$8 sps:$4 sm:$0xff]   ;;  %v277_v51 = vpack.c.bf16 %v272_v45, %v271_v44 }
  0x11   :  { %170 = vmatprep.subr.bf16.mxu1 %v4638_v37  ;;  %v4596_v48 = vld [vmem:[%s6107_s1 + $0x150] ss:$8 sps:$4 sm:$0xff]   ;;  %v4656_v52 = vld [vmem:[%s6107_s1 + $0x54] ss:$8 sps:$4 sm:$0xff]   ;;  %v4599_v53 = vld [vmem:[%s6107_s1 + $0x160] ss:$8 sps:$4 sm:$0xff]  }
  0x12   :  { %v4604_v54 = vld [vmem:[%s6107_s1 + $0x174] ss:$8 sps:$4 sm:$0xff]   ;;  %v4658_v55 = vld [vmem:[%s6107_s1 + $0x50] ss:$8 sps:$4 sm:$0xff]   ;;  %v4659_v56 = vld [vmem:[%s6107_s1 + $0x64] ss:$8 sps:$4 sm:$0xff]  }
  0x13   :  { %385 = vmatpush1.bf16.msra.mxu0 %v4571_v10  ;;  %v4602_v58 = vld [vmem:[%s6107_s1 + $0x170] ss:$8 sps:$4 sm:$0xff]   ;;  %v4607_v59 = vld [vmem:[%s6107_s1 + $0x184] ss:$8 sps:$4 sm:$0xff]   ;;  %v4664_v60 = vld [vmem:[%s6107_s1 + $0x60] ss:$8 sps:$4 sm:$0xff]  }
  0x14   :  { %386 = vmatprep.subr.bf16.mxu0 %v4572_v11  ;;  %171 = vmatpush1.bf16.msra.mxu1 %v4640_v39  ;;  %v4665_v62 = vld [vmem:[%s6107_s1 + $0x74] ss:$8 sps:$4 sm:$0xff]   ;;  %v4667_v63 = vld [vmem:[%s6107_s1 + $0x70] ss:$8 sps:$4 sm:$0xff]   ;;  %v44_v0 = vld [vmem:[%s6108_s0] sm:$0xff] }
  0x15   :  { %172 = vmatprep.subr.bf16.mxu1 %v4644_v41  ;;  %v45_v2 = vld [vmem:[%s6108_s0 + $0x8] sm:$0xff]  ;;  %v4610_v8 = vld [vmem:[%s6107_s1 + $0x194] ss:$8 sps:$4 sm:$0xff]   ;;  %v4608_v11 = vld [vmem:[%s6107_s1 + $0x190] ss:$8 sps:$4 sm:$0xff]  }
  0x16   :  { %v511_v3 = vld [vmem:[%s6108_s0 + $0x2] sm:$0xff]  ;;  %v512_v4 = vld [vmem:[%s6108_s0 + $0xa] sm:$0xff]  ;;  %v53_v5 = vpack.c.bf16 %v45_v2, %v44_v0  ;;  %v47_v10 = vld [vmem:[%s6108_s0 + $0x18] sm:$0xff] }
  0x17   :  { %387 = vmatpush1.bf16.msra.mxu0 %v4574_v12  ;;  %v520_v6 = vpack.c.bf16 %v512_v4, %v511_v3  ;;  %v4605_v7 = vld [vmem:[%s6107_s1 + $0x180] ss:$8 sps:$4 sm:$0xff]   ;;  %v46_v9 = vld [vmem:[%s6108_s0 + $0x10] sm:$0xff]  ;;  %v4619_v24 = vld [vmem:[%s6107_s1 + $0x1c4] ss:$8 sps:$4 sm:$0xff]  }
  0x18   :  { %388 = vmatprep.subr.bf16.mxu0 %v4575_v13  ;;  %173 = vmatpush1.bf16.msra.mxu1 %v4646_v46  ;;  %v513_v12 = vld [vmem:[%s6108_s0 + $0x12] sm:$0xff]  ;;  %v514_v13 = vld [vmem:[%s6108_s0 + $0x1a] sm:$0xff]  ;;  %v4625_v34 = vld [vmem:[%s6107_s1 + $0x1e4] ss:$8 sps:$4 sm:$0xff]  }
  0x19   :  { %174 = vmatprep.subr.bf16.mxu1 %v4650_v47  ;;  %v4611_v17 = vld [vmem:[%s6107_s1 + $0x1a0] ss:$8 sps:$4 sm:$0xff]   ;;  %v4616_v18 = vld [vmem:[%s6107_s1 + $0x1b4] ss:$8 sps:$4 sm:$0xff]   ;;  %v4626_v41 = vld [vmem:[%s6107_s1 + $0x1f0] ss:$8 sps:$4 sm:$0xff]  }
  0x1a   :  { %v51_v30 = vld [vmem:[%s6108_s0 + $0x38] sm:$0xff]  ;;  %v4623_v37 = vld [vmem:[%s6107_s1 + $0x1e0] ss:$8 sps:$4 sm:$0xff]   ;;  %v4673_v4 = vld [vmem:[%s6107_s1 + $0x264] ss:$8 sps:$4 sm:$0xff]  }
  0x1b   :  { %389 = vmatpush1.bf16.msra.mxu0 %v4577_v14  ;;  %v4613_v14 = vld [vmem:[%s6107_s1 + $0x1a4] ss:$8 sps:$4 sm:$0xff]   ;;  %v518_v32 = vld [vmem:[%s6108_s0 + $0x3a] sm:$0xff]  ;;  %v56_v35 = vpack.c.bf16 %v51_v30, %v50_v29 }
  0x1c   :  { %390 = vmatprep.subr.bf16.mxu0 %v4578_v15  ;;  %175 = vmatpush1.bf16.msra.mxu1 %v4652_v50  ;;  %v54_v15 = vpack.c.bf16 %v47_v10, %v46_v9  ;;  %v52_v39 = vld [vmem:[%s6108_s0 + $0x40] sm:$0xff]  ;;  %v758_v46 = vld [vmem:[%s6108_s0 + $0xb] sm:$0xff]  ;;  %v763_v0 = vld [vmem:[%s6108_s0 + $0x33] sm:$0xff] }
  0x1d   :  { %176 = vmatprep.subr.bf16.mxu1 %v4656_v52  ;;  %v757_v45 = vld [vmem:[%s6108_s0 + $0x3] sm:$0xff]  ;;  %v4641_v50 = vld [vmem:[%s6107_s1 + $0x210] ss:$8 sps:$4 sm:$0xff]  }
  0x1e   :  { %v766_v47 = vpack.c.bf16 %v758_v46, %v757_v45  ;;  %v760_v52 = vld [vmem:[%s6108_s0 + $0x1b] sm:$0xff]  ;;  %v4679_v30 = vld [vmem:[%s6110_s3 + $0x4] ss:$8 sps:$4 sm:$0xff]  }
  0x1f   :  { %391 = vmatpush1.bf16.msra.mxu0 %v4580_v16  ;;  %v521_v16 = vpack.c.bf16 %v514_v13, %v513_v12  ;;  %v4653_v57 = vld [vmem:[%s6107_s1 + $0x230] ss:$8 sps:$4 sm:$0xff]   ;;  %v76_v13 = vlaneseq  ;;  %v1010_v29 = vld [vmem:[%s6108_s0 + $0x3c] sm:$0xff] }
  0x20   :  { %622 = vmatprep.subr.bf16.mxu0 %v4583_v19  ;;  %177 = vmatpush1.bf16.msra.mxu1 %v4658_v55  ;;  %v48_v19 = vld [vmem:[%s6108_s0 + $0x20] sm:$0xff]  ;;  %v4668_v3 = vld [vmem:[%s6107_s1 + $0x250] ss:$8 sps:$4 sm:$0xff]   ;;  %v4700_v46 = vld [vmem:[%s6110_s3 + $0x74] ss:$8 sps:$4 sm:$0xff]  }
  0x21   :  { %178 = vmatprep.subr.bf16.mxu1 %v4659_v56  ;;  %v4647_v55 = vld [vmem:[%s6107_s1 + $0x220] ss:$8 sps:$4 sm:$0xff]   ;;  %v4655_v56 = vld [vmem:[%s6107_s1 + $0x234] ss:$8 sps:$4 sm:$0xff]   ;;  %v4674_v9 = vld [vmem:[%s6107_s1 + $0x270] ss:$8 sps:$4 sm:$0xff]  }
  0x22   :  { %409 = vmatmul.mubr.bf16.vlgmr.msra.gmra.mrb[0].mxu0 %v274_v20  ;;  %v49_v20 = vld [vmem:[%s6108_s0 + $0x28] sm:$0xff]  ;;  %v764_v2 = vld [vmem:[%s6108_s0 + $0x3b] sm:$0xff] }
  0x23   :  { %623 = vmatpush1.bf16.msra.mxu0 %v4581_v21  ;;  %418 = vmatprep.mubr.bf16.mxu0 %v4798_v1  ;;  %v4614_v21 = vld [vmem:[%s6107_s1 + $0x1b0] ss:$8 sps:$4 sm:$0xff]   ;;  %v55_v25 = vpack.c.bf16 %v49_v20, %v48_v19  ;;  %v1422_v19 = vld [vmem:[%s6109_s4] sm:$0x3] }
  0x24   :  { %624 = vmatprep.subr.bf16.mxu0 %v4586_v22  ;;  %179 = vmatpush1.bf16.msra.mxu1 %v4664_v60  ;;  %v515_v22 = vld [vmem:[%s6108_s0 + $0x22] sm:$0xff]  ;;  %v1004_v12 = vld [vmem:[%s6108_s0 + $0xc] sm:$0xff] }
  0x25   :  { %180 = vmatprep.subr.bf16.mxu1 %v4665_v62  ;;  %v4663_v60 = vld [vmem:[%s6107_s1 + $0x244] ss:$8 sps:$4 sm:$0xff]   ;;  %v4661_v62 = vld [vmem:[%s6107_s1 + $0x240] ss:$8 sps:$4 sm:$0xff]  }
  0x26   :  { %v4695_v45 = vld [vmem:[%s6110_s3 + $0x60] ss:$8 sps:$4 sm:$0xff]  }
  0x27   :  { %625 = vmatpush1.bf16.msra.mxu0 %v4584_v23  ;;  %v516_v23 = vld [vmem:[%s6108_s0 + $0x2a] sm:$0xff] }
  0x28   :  { %626 = vmatprep.subr.bf16.mxu0 %v4589_v26  ;;  %181 = vmatpush1.bf16.msra.mxu1 %v4667_v63  ;;  %v522_v26 = vpack.c.bf16 %v516_v23, %v515_v22  ;;  %v4670_v63 = vld [vmem:[%s6107_s1 + $0x254] ss:$8 sps:$4 sm:$0xff]  }
  0x29   :  { %1514 = vmatprep.subr.bf16.mxu1 %v4679_v30 }
  0x2a   :  { %419 = vmatmul.mubr.bf16.gmra.mrb[4].mxu0 %v275_v28  ;;  %v4622_v28 = vld [vmem:[%s6107_s1 + $0x1d4] ss:$8 sps:$4 sm:$0xff]  }
  0x2b   :  { %627 = vmatpush1.bf16.msra.mxu0 %v4587_v27  ;;  %428 = vmatprep.mubr.bf16.mxu0 %v4798_v1  ;;  %v4617_v27 = vld [vmem:[%s6107_s1 + $0x1c0] ss:$8 sps:$4 sm:$0xff]  }
  0x2c   :  { %628 = vmatprep.subr.bf16.mxu0 %v4592_v31  ;;  %199 = vmatmul.mubr.bf16.vlgmr.msra.gmra.mrb[0].mxu1 %v53_v5  ;;  %v517_v31 = vld [vmem:[%s6108_s0 + $0x32] sm:$0xff]  ;;  %v769_v5 = vpack.c.bf16 %v764_v2, %v763_v0 }
  0x2d   :  { %208 = vmatprep.mubr.bf16.mxu1 %v4798_v1  ;;  %v523_v36 = vpack.c.bf16 %v518_v32, %v517_v31  ;;  %v1011_v32 = vld [vmem:[%s6108_s0 + $0x44] sm:$0xff] }
  0x2f   :  { %629 = vmatpush1.bf16.msra.mxu0 %v4590_v33  ;;  %v4620_v33 = vld [vmem:[%s6107_s1 + $0x1d0] ss:$8 sps:$4 sm:$0xff]  }
  0x30   :  { %630 = vmatprep.subr.bf16.mxu0 %v4595_v38  ;;  %v4628_v38 = vld [vmem:[%s6107_s1 + $0x1f4] ss:$8 sps:$4 sm:$0xff]  }
  0x32   :  { %429 = vmatmul.mubr.bf16.gmra.mrb[8].mxu0 %v276_v40  ;;  %v519_v40 = vld [vmem:[%s6108_s0 + $0x42] sm:$0xff] }
  0x33   :  { %631 = vmatpush1.bf16.msra.mxu0 %v4593_v42  ;;  %438 = vmatprep.mubr.bf16.mxu0 %v4798_v1  ;;  %v4636_v42 = vld [vmem:[%s6107_s1 + $0x204] ss:$8 sps:$4 sm:$0xff]   ;;  %v524_v44 = vpack.c.bf16 %v519_v40, %v519_v40 }
  0x34   :  { %632 = vmatprep.subr.bf16.mxu0 %v4598_v43  ;;  %209 = vmatmul.mubr.bf16.gmra.mrb[4].mxu1 %v54_v15  ;;  %v57_v43 = vpack.c.bf16 %v52_v39, %v52_v39  ;;  %v5238_v15 = vshrl.u32 %v76_v13, 7  ;;  %v4686_v39 = vld [vmem:[%s6110_s3 + $0x30] ss:$8 sps:$4 sm:$0xff]   ;;  %v4691_v40 = vld [vmem:[%s6110_s3 + $0x44] ss:$8 sps:$4 sm:$0xff]  }
  0x35   :  { %218 = vmatprep.mubr.bf16.mxu1 %v4798_v1 }
  0x36   :  { %v82_v20 = vsub.s32 1, %v5238_v15 }
  0x37   :  { %633 = vmatpush1.bf16.msra.mxu0 %v4596_v48  ;;  %v4634_v48 = vld [vmem:[%s6107_s1 + $0x200] ss:$8 sps:$4 sm:$0xff]  }
  0x38   :  { %634 = vmatprep.subr.bf16.mxu0 %v4601_v49  ;;  %v4643_v49 = vld [vmem:[%s6107_s1 + $0x214] ss:$8 sps:$4 sm:$0xff]   ;;  %v1431_v23 = vrot.slane %v1422_v19, %v82_v20 }
  0x3a   :  { %439 = vmatmul.mubr.bf16.gmra.mrb[12].mxu0 %v277_v51  ;;  %v759_v51 = vld [vmem:[%s6108_s0 + $0x13] sm:$0xff]  ;;  %4353 = vst [vmem:[#allocation4 + $0x8] sm:$0xff] %v1431_v23  ;;  %4359 = vst [vmem:[#allocation4 + $0x18] sm:$0xff] %v1431_v23 }
  0x3b   :  { %448 = vmatprep.mubr.bf16.mxu0 %v4798_v1  ;;  %635 = vmatpush1.bf16.msra.mxu0 %v4599_v53  ;;  %v4649_v53 = vld [vmem:[%s6107_s1 + $0x224] ss:$8 sps:$4 sm:$0xff]   ;;  %4365 = vst [vmem:[#allocation4 + $0x28] sm:$0xff] %v1431_v23  ;;  %4371 = vst [vmem:[#allocation4 + $0x38] sm:$0xff] %v1431_v23 }
  0x3c   :  { %636 = vmatprep.subr.bf16.mxu0 %v4604_v54  ;;  %219 = vmatmul.mubr.bf16.gmra.mrb[8].mxu1 %v55_v25  ;;  %v767_v54 = vpack.c.bf16 %v760_v52, %v759_v51  ;;  %4377 = vst [vmem:[#allocation4 + $0x48] sm:$0xff] %v1431_v23  ;;  %4383 = vst [vmem:[#allocation4 + $0x58] sm:$0xff] %v1431_v23  ;;  %v1008_v25 = vld [vmem:[%s6108_s0 + $0x2c] sm:$0xff] }
  0x3d   :  { %228 = vmatprep.mubr.bf16.mxu1 %v4798_v1  ;;  %4389 = vst [vmem:[#allocation4 + $0x68] sm:$0xff] %v1431_v23  ;;  %4395 = vst [vmem:[#allocation4 + $0x78] sm:$0xff] %v1431_v23 }
  0x3e   :  { %4401 = vst [vmem:[#allocation4 + $0x88] sm:$0xff] %v1431_v23 }
  0x3f   :  { %637 = vmatpush1.bf16.msra.mxu0 %v4602_v58  ;;  %v761_v58 = vld [vmem:[%s6108_s0 + $0x23] sm:$0xff] }
  0x40   :  { %868 = vmatprep.subr.bf16.mxu0 %v4607_v59  ;;  %v762_v59 = vld [vmem:[%s6108_s0 + $0x2b] sm:$0xff] }
  0x42   :  { %449 = vmatmul.mubr.bf16.gmra.mrb[16].mxu0 %v278_v61  ;;  %v768_v61 = vpack.c.bf16 %v762_v59, %v761_v58 }
  0x43   :  { %654 = vmatprep.mubr.bf16.mxu0 %v4798_v1 }
  0x44   :  { %229 = vmatmul.mubr.bf16.gmra.mrb[12].mxu1 %v56_v35  ;;  %v4680_v35 = vld [vmem:[%s6110_s3 + $0x10] ss:$8 sps:$4 sm:$0xff]  }
  0x45   :  { %238 = vmatprep.mubr.bf16.mxu1 %v4798_v1 }
  0x4a   :  { %655 = vmatmul.mubr.bf16.vlgmr.msra.gmra.mrb[0].mxu0 %v520_v6  ;;  %v4671_v6 = vld [vmem:[%s6107_s1 + $0x260] ss:$8 sps:$4 sm:$0xff]  }
  0x4b   :  { %869 = vmatpush1.bf16.msra.mxu0 %v4605_v7  ;;  %664 = vmatprep.mubr.bf16.mxu0 %v4798_v1  ;;  %v4676_v7 = vld [vmem:[%s6107_s1 + $0x274] ss:$8 sps:$4 sm:$0xff]  }
  0x4c   :  { %870 = vmatprep.subr.bf16.mxu0 %v4610_v8  ;;  %239 = vmatmul.mubr.bf16.gmra.mrb[16].mxu1 %v57_v43  ;;  %v765_v8 = vld [vmem:[%s6108_s0 + $0x43] sm:$0xff]  ;;  %v4692_v43 = vld [vmem:[%s6110_s3 + $0x50] ss:$8 sps:$4 sm:$0xff]  }
  0x4d   :  { %1546 = vmatprep.mubr.bf16.mxu1 %v4798_v1  ;;  %v770_v10 = vpack.c.bf16 %v765_v8, %v765_v8 }
  0x4f   :  { %871 = vmatpush1.bf16.msra.mxu0 %v4608_v11  ;;  %v1003_v11 = vld [vmem:[%s6108_s0 + $0x4] sm:$0xff] }
  0x50   :  { %872 = vmatprep.subr.bf16.mxu0 %v4613_v14  ;;  %v1012_v14 = vpack.c.bf16 %v1004_v12, %v1003_v11 }
  0x52   :  { %665 = vmatmul.mubr.bf16.gmra.mrb[4].mxu0 %v521_v16  ;;  %v1005_v16 = vld [vmem:[%s6108_s0 + $0x14] sm:$0xff] }
  0x53   :  { %873 = vmatpush1.bf16.msra.mxu0 %v4611_v17  ;;  %674 = vmatprep.mubr.bf16.mxu0 %v4798_v1  ;;  %v1006_v17 = vld [vmem:[%s6108_s0 + $0x1c] sm:$0xff] }
  0x54   :  { %874 = vmatprep.subr.bf16.mxu0 %v4616_v18  ;;  %v78_v18 = vsub.s32 0, %v5238_v15  ;;  %v1013_v22 = vpack.c.bf16 %v1006_v17, %v1005_v16 }
  0x57   :  { %875 = vmatpush1.bf16.msra.mxu0 %v4614_v21  ;;  %v1427_v21 = vrot.slane %v1422_v19, %v78_v18 }
  0x58   :  { %876 = vmatprep.subr.bf16.mxu0 %v4619_v24  ;;  %v1007_v24 = vld [vmem:[%s6108_s0 + $0x24] sm:$0xff] }
  0x59   :  { %4350 = vst [vmem:[#allocation4] sm:$0xff] %v1427_v21  ;;  %4356 = vst [vmem:[#allocation4 + $0x10] sm:$0xff] %v1427_v21 }
  0x5a   :  { %675 = vmatmul.mubr.bf16.gmra.mrb[8].mxu0 %v522_v26  ;;  %4362 = vst [vmem:[#allocation4 + $0x20] sm:$0xff] %v1427_v21  ;;  %4368 = vst [vmem:[#allocation4 + $0x30] sm:$0xff] %v1427_v21  ;;  %v1014_v26 = vpack.c.bf16 %v1008_v25, %v1007_v24 }
  0x5b   :  { %877 = vmatpush1.bf16.msra.mxu0 %v4617_v27  ;;  %684 = vmatprep.mubr.bf16.mxu0 %v4798_v1  ;;  %4374 = vst [vmem:[#allocation4 + $0x40] sm:$0xff] %v1427_v21  ;;  %4380 = vst [vmem:[#allocation4 + $0x50] sm:$0xff] %v1427_v21  ;;  %v4677_v27 = vld [vmem:[%s6110_s3] ss:$8 sps:$4 sm:$0xff]  }
  0x5c   :  { %878 = vmatprep.subr.bf16.mxu0 %v4622_v28  ;;  %4386 = vst [vmem:[#allocation4 + $0x60] sm:$0xff] %v1427_v21  ;;  %4392 = vst [vmem:[#allocation4 + $0x70] sm:$0xff] %v1427_v21  ;;  %v1009_v28 = vld [vmem:[%s6108_s0 + $0x34] sm:$0xff]  ;;  %1515 = vmatpush1.bf16.msra.mxu1 %v4677_v27 }
  0x5d   :  { %4398 = vst [vmem:[#allocation4 + $0x80] sm:$0xff] %v1427_v21  ;;  %v1015_v31 = vpack.c.bf16 %v1010_v29, %v1009_v28 }
  0x5f   :  { %879 = vmatpush1.bf16.msra.mxu0 %v4620_v33  ;;  %v1016_v33 = vpack.c.bf16 %v1011_v32, %v1011_v32 }
  0x60   :  { %880 = vmatprep.subr.bf16.mxu0 %v4625_v34  ;;  %v4682_v34 = vld [vmem:[%s6110_s3 + $0x14] ss:$8 sps:$4 sm:$0xff]  }
  0x61   :  { %1516 = vmatprep.subr.bf16.mxu1 %v4682_v34 }
  0x62   :  { %685 = vmatmul.mubr.bf16.gmra.mrb[12].mxu0 %v523_v36  ;;  %1517 = vmatpush1.bf16.msra.mxu1 %v4680_v35  ;;  %v4685_v36 = vld [vmem:[%s6110_s3 + $0x24] ss:$8 sps:$4 sm:$0xff]  }
  0x63   :  { %694 = vmatprep.mubr.bf16.mxu0 %v4798_v1  ;;  %881 = vmatpush1.bf16.msra.mxu0 %v4623_v37  ;;  %v4683_v37 = vld [vmem:[%s6110_s3 + $0x20] ss:$8 sps:$4 sm:$0xff]  }
  0x64   :  { %882 = vmatprep.subr.bf16.mxu0 %v4628_v38  ;;  %1518 = vmatprep.subr.bf16.mxu1 %v4685_v36  ;;  %v4688_v38 = vld [vmem:[%s6110_s3 + $0x34] ss:$8 sps:$4 sm:$0xff]  }
  0x66   :  { %1519 = vmatpush1.bf16.msra.mxu1 %v4683_v37 }
  0x67   :  { %883 = vmatpush1.bf16.msra.mxu0 %v4626_v41  ;;  %1520 = vmatprep.subr.bf16.mxu1 %v4688_v38  ;;  %v4689_v41 = vld [vmem:[%s6110_s3 + $0x40] ss:$8 sps:$4 sm:$0xff]  }
  0x68   :  { %1114 = vmatprep.subr.bf16.mxu0 %v4636_v42  ;;  %v4694_v42 = vld [vmem:[%s6110_s3 + $0x54] ss:$8 sps:$4 sm:$0xff]  }
  0x6a   :  { %695 = vmatmul.mubr.bf16.gmra.mrb[16].mxu0 %v524_v44  ;;  %1521 = vmatpush1.bf16.msra.mxu1 %v4686_v39  ;;  %v4697_v44 = vld [vmem:[%s6110_s3 + $0x64] ss:$8 sps:$4 sm:$0xff]  }
  0x6b   :  { %900 = vmatprep.mubr.bf16.mxu0 %v4798_v1  ;;  %1522 = vmatprep.subr.bf16.mxu1 %v4691_v40 }
  0x6e   :  { %1523 = vmatpush1.bf16.msra.mxu1 %v4689_v41 }
  0x6f   :  { %1524 = vmatprep.subr.bf16.mxu1 %v4694_v42 }
  0x72   :  { %901 = vmatmul.mubr.bf16.vlgmr.msra.gmra.mrb[0].mxu0 %v766_v47  ;;  %1525 = vmatpush1.bf16.msra.mxu1 %v4692_v43  ;;  %v4698_v47 = vld [vmem:[%s6110_s3 + $0x70] ss:$8 sps:$4 sm:$0xff]  }
  0x73   :  { %1115 = vmatpush1.bf16.msra.mxu0 %v4634_v48  ;;  %910 = vmatprep.mubr.bf16.mxu0 %v4798_v1  ;;  %v4799_v48 = vmov 0.0  }
  0x74   :  { %1116 = vmatprep.subr.bf16.mxu0 %v4643_v49  ;;  %1526 = vmatprep.subr.bf16.mxu1 %v4697_v44  ;;  %39 = vst [vmem:[#allocation2 + $0x90] sm:$0xff] %v4799_v48  ;;  %40 = vst [vmem:[#allocation2 + $0x98] sm:$0xff] %v4799_v48  ;;  %v4703_v49 = vld [vmem:[%s6110_s3 + $0x84] ss:$8 sps:$4 sm:$0xff]  }
  0x75   :  { %41 = vst [vmem:[#allocation3 + $0x48] sm:$0xff] %v4799_v48  ;;  %42 = vst [vmem:[#allocation4 + $0x90] sm:$0xff] %v4799_v48 }
  0x76   :  { %1527 = vmatpush1.bf16.msra.mxu1 %v4695_v45  ;;  %43 = vst [vmem:[#allocation4 + $0x98] sm:$0xff] %v4799_v48 }
  0x77   :  { %1117 = vmatpush1.bf16.msra.mxu0 %v4641_v50  ;;  %1528 = vmatprep.subr.bf16.mxu1 %v4700_v46  ;;  %v74_v50 = vld [vmem:[%s6111_s2] sm:$0x3] }
  0x78   :  { %1118 = vmatprep.subr.bf16.mxu0 %v4649_v53  ;;  %v83_v51 = vrot.slane %v74_v50, %v82_v20  ;;  %v5353_v20 = vrot.slane %v74_v50, %v78_v18 }
  0x7a   :  { %911 = vmatmul.mubr.bf16.gmra.mrb[4].mxu0 %v767_v54  ;;  %1529 = vmatpush1.bf16.msra.mxu1 %v4698_v47 }
  0x7b   :  { %1119 = vmatpush1.bf16.msra.mxu0 %v4647_v55  ;;  %920 = vmatprep.mubr.bf16.mxu0 %v4798_v1 }
  0x7c   :  { %1120 = vmatprep.subr.bf16.mxu0 %v4655_v56  ;;  %1724 = vmatprep.subr.bf16.mxu1 %v4703_v49 }
  0x7f   :  { %1121 = vmatpush1.bf16.msra.mxu0 %v4653_v57 }
  0x80   :  { %1122 = vmatprep.subr.bf16.mxu0 %v4663_v60 }
  0x82   :  { %921 = vmatmul.mubr.bf16.gmra.mrb[8].mxu0 %v768_v61 }
  0x83   :  { %1123 = vmatpush1.bf16.msra.mxu0 %v4661_v62  ;;  %930 = vmatprep.mubr.bf16.mxu0 %v4798_v1 }
  0x84   :  { %1124 = vmatprep.subr.bf16.mxu0 %v4670_v63 }
  0x87   :  { %1125 = vmatpush1.bf16.msra.mxu0 %v4668_v3 }
  0x88   :  { %1126 = vmatprep.subr.bf16.mxu0 %v4673_v4 }
  0x8a   :  { %931 = vmatmul.mubr.bf16.gmra.mrb[12].mxu0 %v769_v5 }
  0x8b   :  { %940 = vmatprep.mubr.bf16.mxu0 %v4798_v1  ;;  %1127 = vmatpush1.bf16.msra.mxu0 %v4671_v6 }
  0x8c   :  { %1128 = vmatprep.subr.bf16.mxu0 %v4676_v7 }
  0x8f   :  { %1129 = vmatpush1.bf16.msra.mxu0 %v4674_v9 }
  0x92   :  { %941 = vmatmul.mubr.bf16.gmra.mrb[16].mxu0 %v770_v10 }
  0x93   :  { %1146 = vmatprep.mubr.bf16.mxu0 %v4798_v1 }
  0x9a   :  { %1147 = vmatmul.mubr.bf16.vlgmr.msra.gmra.mrb[0].mxu0 %v1012_v14 }
  0x9b   :  { %1156 = vmatprep.mubr.bf16.mxu0 %v4798_v1 }
  0xa2   :  { %1157 = vmatmul.mubr.bf16.gmra.mrb[4].mxu0 %v1013_v22 }
  0xa3   :  { %1166 = vmatprep.mubr.bf16.mxu0 %v4798_v1 }
  0xaa   :  { %1167 = vmatmul.mubr.bf16.gmra.mrb[8].mxu0 %v1014_v26 }
  0xab   :  { %1176 = vmatprep.mubr.bf16.mxu0 %v4798_v1 }
  0xb2   :  { %1177 = vmatmul.mubr.bf16.gmra.mrb[12].mxu0 %v1015_v31 }
  0xb3   :  { %1186 = vmatprep.mubr.bf16.mxu0 %v4798_v1 }
  0xba   :  { %1187 = vmatmul.mubr.bf16.gmra.mrb[16].mxu0 %v1016_v33 }
  0xbb   :  { %3921 = vmatprep.mubr.msk.f32.mxu0 %vm4801_vm1, %v4799_v48 }
  0xff   :  { %v200_v52 = vpop.f32.mrb[0].mxu1 }
 0x100   :  { %v202_v53 = vpop.f32.mrb[1].mxu1  ;;  %v201_v21 = vadd.f32 %v200_v52, %v5353_v20 }
 0x101   :  { %v203_v54 = vadd.f32 %v202_v53, %v83_v51  ;;  %v204_v55 = vpop.f32.mrb[2].mxu1 }
 0x102   :  { %v206_v56 = vpop.f32.mrb[3].mxu1  ;;  %v205_v23 = vadd.f32 %v204_v55, %v5353_v20 }
 0x103   :  { %v207_v57 = vadd.f32 %v206_v56, %v83_v51 }
 0x107   :  { %v210_v58 = vpop.f32.mrb[4].mxu1 }
 0x108   :  { %v212_v59 = vpop.f32.mrb[5].mxu1  ;;  %v211_v31 = vadd.f32 %v210_v58, %v5353_v20 }
 0x109   :  { %v213_v60 = vadd.f32 %v212_v59, %v83_v51  ;;  %v214_v61 = vpop.f32.mrb[6].mxu1 }
 0x10a   :  { %v216_v62 = vpop.f32.mrb[7].mxu1  ;;  %v215_v15 = vadd.f32 %v214_v61, %v5353_v20 }
 0x10b   :  { %v217_v63 = vadd.f32 %v216_v62, %v83_v51 }
 0x10f   :  { %v220_v0 = vpop.f32.mrb[8].mxu1 }
 0x110   :  { %v222_v2 = vpop.f32.mrb[9].mxu1  ;;  %v221_v49 = vadd.f32 %v220_v0, %v5353_v20 }
 0x111   :  { %v5335_v3 = vadd.f32 %v222_v2, %v83_v51  ;;  %v224_v4 = vpop.f32.mrb[10].mxu1 }
 0x112   :  { %v226_v5 = vpop.f32.mrb[11].mxu1 }
 0x113   :  { %v5337_v6 = vadd.f32 %v226_v5, %v83_v51 }
 0x117   :  { %v5339_v7 = vpop.f32.mrb[12].mxu1 }
 0x118   :  { %v232_v8 = vpop.f32.mrb[13].mxu1 }
 0x119   :  { %v5341_v9 = vadd.f32 %v232_v8, %v83_v51  ;;  %v5343_v10 = vpop.f32.mrb[14].mxu1 }
 0x11a   :  { %v236_v11 = vpop.f32.mrb[15].mxu1 }
 0x11b   :  { %v5345_v12 = vadd.f32 %v236_v11, %v83_v51 }
 0x11f   :  { %v5347_v13 = vpop.f32.mrb[16].mxu1 }
 0x120   :  { %v242_v14 = vpop.f32.mrb[17].mxu1 }
 0x121   :  { %v5349_v16 = vadd.f32 %v242_v14, %v83_v51  ;;  %v244_v17 = vpop.f32.mrb[18].mxu1 }
 0x122   :  { %v245_v19 = vpop.f32.mrb[19].mxu1 }
 0x16d   :  { %v1148_v22 = vpop.f32.mrb[0].mxu0 }
 0x16e   :  { %v4281_v24 = vadd.f32 %v1148_v22, %v201_v21  ;;  %v1150_v25 = vpop.f32.mrb[1].mxu0 }
 0x16f   :  { %v4285_v26 = vadd.f32 %v1150_v25, %v203_v54  ;;  %v1152_v27 = vpop.f32.mrb[2].mxu0 }
 0x170   :  { %1231 = vst [vmem:[#allocation2] sm:$0xff] %v4281_v24  ;;  %v4289_v28 = vadd.f32 %v1152_v27, %v205_v23  ;;  %v1154_v29 = vpop.f32.mrb[3].mxu0 }
 0x171   :  { %1232 = vst [vmem:[#allocation2 + $0x8] sm:$0xff] %v4285_v26  ;;  %v4293_v30 = vadd.f32 %v1154_v29, %v207_v57 }
 0x172   :  { %v1273_v39 = vrot.slane %v4289_v28, 1 }
 0x173   :  { %v1276_v44 = vrot.slane %v4293_v30, 1 }
 0x175   :  { %v1158_v32 = vpop.f32.mrb[4].mxu0 }
 0x176   :  { %v4297_v18 = vadd.f32 %v1158_v32, %v211_v31  ;;  %v1160_v33 = vpop.f32.mrb[5].mxu0 }
 0x177   :  { %v1257_v34 = vld [vmem:[#allocation2] sm:$0xfe]  ;;  %v4301_v35 = vadd.f32 %v1160_v33, %v213_v60  ;;  %v1162_v36 = vpop.f32.mrb[6].mxu0  ;;  %v225_v60 = vadd.f32 %v224_v4, %v5353_v20 }
 0x178   :  { %v1272_v37 = vrot.slane %v1257_v34, 1  ;;  %v1258_v38 = vld [vmem:[#allocation2 + $0x8] sm:$0xfe]  ;;  %v1278_v40 = vrot.slane %v4297_v18, 1  ;;  %v5359_v41 = vadd.f32 %v1162_v36, %v215_v15  ;;  %v1164_v42 = vpop.f32.mrb[7].mxu0 }
 0x179   :  { %v1275_v43 = vrot.slane %v1258_v38, 1  ;;  %v1280_v45 = vrot.slane %v4301_v35, 1  ;;  %v5361_v46 = vadd.f32 %v1164_v42, %v217_v63  ;;  %v1334_v34 = vld [vmem:[#allocation2 + $0x90] sm:$0x1] }
 0x17a   :  { %v1274_v47 = vsel %vm1271_vm0, %v1272_v37, %v1273_v39  ;;  %v1279_v50 = vsel %vm1271_vm0, %v1273_v39, %v1278_v40  ;;  %v1282_v51 = vrot.slane %v5359_v41, 1  ;;  %v4707_v39 = vld [vmem:[%s6110_s3 + $0xa0] ss:$8 sps:$4 sm:$0xff]  }
 0x17b   :  { %v1298_v52 = vmax.f32 %v4281_v24, %v1274_v47  ;;  %v1277_v53 = vsel %vm1271_vm0, %v1275_v43, %v1276_v44  ;;  %v1300_v54 = vmax.f32 %v4289_v28, %v1279_v50  ;;  %v1281_v55 = vsel %vm1271_vm0, %v1276_v44, %v1280_v45  ;;  %v4701_v24 = vld [vmem:[%s6110_s3 + $0x80] ss:$8 sps:$4 sm:$0xff]  }
 0x17c   :  { %v1299_v56 = vmax.f32 %v4285_v26, %v1277_v53  ;;  %v1301_v57 = vmax.f32 %v4293_v30, %v1281_v55  ;;  %v1284_v58 = vrot.slane %v5361_v46, 1  ;;  %v1283_v59 = vsel %vm1271_vm0, %v1278_v40, %v1282_v51 }
 0x17d   :  { %v1168_v61 = vpop.f32.mrb[8].mxu0  ;;  %v1302_v62 = vmax.f32 %v4297_v18, %v1283_v59  ;;  %v235_v28 = vadd.f32 %v5343_v10, %v5353_v20  ;;  %v4709_v10 = vld [vmem:[%s6110_s3 + $0xa4] ss:$8 sps:$4 sm:$0xff]   ;;  %v241_v43 = vadd.f32 %v5347_v13, %v5353_v20 }
 0x17e   :  { %v1306_v63 = vmax.f32 %v1298_v52, %v1299_v56  ;;  %v1307_v0 = vmax.f32 %v1300_v54, %v1301_v57  ;;  %v4313_v2 = vadd.f32 %v1168_v61, %v221_v49  ;;  %v1170_v5 = vpop.f32.mrb[9].mxu0  ;;  %v1285_v8 = vsel %vm1271_vm0, %v1280_v45, %v1284_v58  ;;  %v1335_v57 = vld [vmem:[#allocation2 + $0x98] sm:$0x1] }
 0x17f   :  { %v4317_v11 = vadd.f32 %v1170_v5, %v5335_v3  ;;  %v1172_v14 = vpop.f32.mrb[10].mxu0  ;;  %v1303_v17 = vmax.f32 %v4301_v35, %v1285_v8  ;;  %v231_v3 = vadd.f32 %v5339_v7, %v5353_v20  ;;  %v4704_v7 = vld [vmem:[%s6110_s3 + $0x90] ss:$8 sps:$4 sm:$0xff]  }
 0x180   :  { %v1310_v19 = vmax.f32 %v1306_v63, 0.0  ;;  %v5378_v21 = vmax.f32 %v1307_v0, 0.0  ;;  %1239 = vst [vmem:[#allocation2 + $0x40] sm:$0xff] %v4313_v2  ;;  %v5380_v22 = vadd.f32 %v1172_v14, %v225_v60  ;;  %v1174_v4 = vpop.f32.mrb[11].mxu0 }
 0x181   :  { %1240 = vst [vmem:[#allocation2 + $0x48] sm:$0xff] %v4317_v11  ;;  %v5383_v23 = vadd.f32 %v1174_v4, %v5337_v6  ;;  %v1308_v25 = vmax.f32 %v1302_v62, %v1303_v17  ;;  %v4706_v6 = vld [vmem:[%s6110_s3 + $0x94] ss:$8 sps:$4 sm:$0xff]   ;;  %v1362_v17 = vrot.slane %v1335_v57, 1  ;;  %v4733_v57 = vld [vmem:[%s6110_s3 + $0x124] ss:$8 sps:$4 sm:$0xff]  }
 0x182   :  { %1314 = vst [vmem:[#allocation3] sm:$0xff] %v1310_v19  ;;  %1315 = vst [vmem:[#allocation3 + $0x8] sm:$0xff] %v5378_v21  ;;  %v1401_v26 = vpack.c.bf16 %v5378_v21, %v1310_v19 }
 0x183   :  { %1241 = vst [vmem:[#allocation2 + $0x50] sm:$0xff] %v5380_v22  ;;  %1242 = vst [vmem:[#allocation2 + $0x58] sm:$0xff] %v5383_v23  ;;  %v5397_v27 = vmax.f32 %v1308_v25, 0.0 }
 0x184   :  { %1547 = vmatmul.mubr.bf16.vlgmr.msra.gmra.mrb[20].mxu1 %v1401_v26 }
 0x185   :  { %v1178_v29 = vpop.f32.mrb[12].mxu0  ;;  %1725 = vmatpush1.bf16.msra.mxu1 %v4701_v24  ;;  %1556 = vmatprep.mubr.bf16.mxu1 %v4798_v1  ;;  %1316 = vst [vmem:[#allocation3 + $0x10] sm:$0xff] %v5397_v27  ;;  %v2360_v30 = vpack.c.bf16 %v5397_v27, %v5378_v21  ;;  %v4800_v21 = vmov 0.0|0.0  }
 0x186   :  { %v4329_v31 = vadd.f32 %v1178_v29, %v231_v3  ;;  %v1180_v32 = vpop.f32.mrb[13].mxu0  ;;  %1726 = vmatprep.subr.bf16.mxu1 %v4706_v6  ;;  %4122 = vmatprep.subr.bf16.mxu0 %v4800_v21 }
 0x187   :  { %v1259_v15 = vld [vmem:[#allocation2 + $0x40] sm:$0x1]  ;;  %v4333_v18 = vadd.f32 %v1180_v32, %v5341_v9  ;;  %v1182_v33 = vpop.f32.mrb[14].mxu0  ;;  %v4712_v9 = vld [vmem:[%s6110_s3 + $0xb4] ss:$8 sps:$4 sm:$0xff]  }
 0x188   :  { %v1286_v35 = vrot.slane %v1259_v15, 1  ;;  %v1260_v36 = vld [vmem:[#allocation2 + $0x48] sm:$0x1]  ;;  %v5412_v37 = vadd.f32 %v1182_v33, %v235_v28  ;;  %v1184_v38 = vpop.f32.mrb[15].mxu0  ;;  %v1347_v44 = vrot.slane %v4329_v31, 1 }
 0x189   :  { %v1288_v40 = vrot.slane %v1260_v36, 1  ;;  %v5420_v45 = vadd.f32 %v1184_v38, %v5345_v12  ;;  %1727 = vmatpush1.bf16.msra.mxu1 %v4704_v7  ;;  %v1350_v52 = vrot.slane %v4333_v18, 1  ;;  %v5460_v7 = vld [vmem:[#allocation3 + $0x20] sm:$0xff]  ;;  %v4716_v36 = vld [vmem:[%s6110_s3 + $0xd0] ss:$8 sps:$4 sm:$0xff]  }
 0x18a   :  { %v1326_v42 = vld [vmem:[#allocation2 + $0x50] sm:$0xfe]  ;;  %v1287_v47 = vsel %vm1271_vm0, %v1282_v51, %v1286_v35  ;;  %v1327_v50 = vld [vmem:[#allocation2 + $0x58] sm:$0xfe]  ;;  %v1352_v53 = vrot.slane %v5412_v37, 1  ;;  %1728 = vmatprep.subr.bf16.mxu1 %v4709_v10  ;;  %v1360_v51 = vrot.slane %v1334_v34, 1 }
 0x18b   :  { %v1346_v49 = vrot.slane %v1326_v42, 1  ;;  %v1289_v12 = vsel %vm1271_vm0, %v1284_v58, %v1288_v40  ;;  %v1349_v13 = vrot.slane %v1327_v50, 1  ;;  %v1354_v20 = vrot.slane %v5420_v45, 1  ;;  %v4710_v58 = vld [vmem:[%s6110_s3 + $0xb0] ss:$8 sps:$4 sm:$0xff]  }
 0x18c   :  { %v1304_v54 = vmax.f32 %v5359_v41, %v1287_v47  ;;  %v1353_v56 = vsel %vm1271_vm0, %v1347_v44, %v1352_v53  ;;  %v1305_v59 = vmax.f32 %v5361_v46, %v1289_v12  ;;  %v4715_v46 = vld [vmem:[%s6110_s3 + $0xc4] ss:$8 sps:$4 sm:$0xff]  }
 0x18d   :  { %v1348_v55 = vsel %vm1271_vm0, %v1346_v49, %v1347_v44  ;;  %v1351_v60 = vsel %vm1271_vm0, %v1349_v13, %v1350_v52  ;;  %v1355_v61 = vsel %vm1271_vm0, %v1350_v52, %v1354_v20  ;;  %v1188_v62 = vpop.f32.mrb[16].mxu0  ;;  %1729 = vmatpush1.bf16.msra.mxu1 %v4707_v39  ;;  %v1374_v63 = vmax.f32 %v4329_v31, %v1353_v56  ;;  %v4718_v31 = vld [vmem:[%s6110_s3 + $0xd4] ss:$8 sps:$4 sm:$0xff]   ;;  %v4722_v52 = vld [vmem:[%s6110_s3 + $0xf0] ss:$8 sps:$4 sm:$0xff]  }
 0x18e   :  { %v1372_v41 = vmax.f32 %v5380_v22, %v1348_v55  ;;  %v4345_v0 = vadd.f32 %v1188_v62, %v241_v43  ;;  %v1190_v2 = vpop.f32.mrb[17].mxu0  ;;  %v1309_v5 = vmax.f32 %v1304_v54, %v1305_v59  ;;  %1730 = vmatprep.subr.bf16.mxu1 %v4712_v9  ;;  %v1373_v8 = vmax.f32 %v5383_v23, %v1351_v60  ;;  %v4713_v23 = vld [vmem:[%s6110_s3 + $0xc0] ss:$8 sps:$4 sm:$0xff]   ;;  %v4724_v49 = vld [vmem:[%s6110_s3 + $0xf4] ss:$8 sps:$4 sm:$0xff]  }
 0x18f   :  { %v1375_v11 = vmax.f32 %v4333_v18, %v1355_v61  ;;  %v4349_v14 = vadd.f32 %v1190_v2, %v5349_v16  ;;  %v1192_v19 = vpop.f32.mrb[18].mxu0  ;;  %v1614_v13 = vld [vmem:[#allocation3 + $0xa] sm:$0xff]  ;;  %v4730_v56 = vld [vmem:[%s6110_s3 + $0x114] ss:$8 sps:$4 sm:$0xff]  }
 0x190   :  { %v1356_v4 = vrot.slane %v4345_v0, 1  ;;  %v1193_v24 = vpop.f32.mrb[19].mxu0  ;;  %v5448_v25 = vmax.f32 %v1309_v5, 0.0  ;;  %v1380_v22 = vmax.f32 %v1372_v41, %v1373_v8  ;;  %v4725_v54 = vld [vmem:[%s6110_s3 + $0x100] ss:$8 sps:$4 sm:$0xff]  }
 0x191   :  { %v1381_v3 = vmax.f32 %v1374_v63, %v1375_v11  ;;  %v1358_v26 = vrot.slane %v4349_v14, 1  ;;  %1731 = vmatpush1.bf16.msra.mxu1 %v4710_v58  ;;  %v4731_v61 = vld [vmem:[%s6110_s3 + $0x120] ss:$8 sps:$4 sm:$0xff]   ;;  %v4736_v58 = vld [vmem:[%s6110_s3 + $0x134] ss:$8 sps:$4 sm:$0xff]  }
 0x192   :  { %v1357_v6 = vsel %vm1271_vm0, %v1352_v53, %v1356_v4  ;;  %v1361_v28 = vsel %vm1271_vm0, %v1356_v4, %v1360_v51  ;;  %1317 = vst [vmem:[#allocation3 + $0x18] sm:$0xff] %v5448_v25  ;;  %v1402_v16 = vpack.c.bf16 %v5448_v25, %v5397_v27  ;;  %v5458_v29 = vmax.f32 %v1380_v22, 0.0  ;;  %1732 = vmatprep.subr.bf16.mxu1 %v4715_v46  ;;  %v4727_v53 = vld [vmem:[%s6110_s3 + $0x104] ss:$8 sps:$4 sm:$0xff]   ;;  %v4728_v51 = vld [vmem:[%s6110_s3 + $0x110] ss:$8 sps:$4 sm:$0xff]  }
 0x193   :  { %v1378_v32 = vmax.f32 %v4345_v0, %v1361_v28  ;;  %v1359_v10 = vsel %vm1271_vm0, %v1354_v20, %v1358_v26  ;;  %v1363_v15 = vsel %vm1271_vm0, %v1358_v26, %v1362_v17  ;;  %v1376_v18 = vmax.f32 %v5412_v37, %v1357_v6  ;;  %v4721_v37 = vld [vmem:[%s6110_s3 + $0xe4] ss:$8 sps:$4 sm:$0xff]   ;;  %v4734_v41 = vld [vmem:[%s6110_s3 + $0x130] ss:$8 sps:$4 sm:$0xff]   ;;  %v4737_v5 = vld [vmem:[%s6110_s3 + $0x140] ss:$8 sps:$4 sm:$0xff]  }
 0x194   :  { %v1379_v33 = vmax.f32 %v4349_v14, %v1363_v15  ;;  %1557 = vmatmul.mubr.bf16.gmra.mrb[24].mxu1 %v1402_v16  ;;  %1388 = vst [vmem:[#allocation3 + $0x28] sm:$0xff] %v5458_v29  ;;  %v1377_v34 = vmax.f32 %v5420_v45, %v1359_v10  ;;  %v5470_v35 = vmax.f32 %v1381_v3, 0.0  ;;  %v2361_v38 = vpack.c.bf16 %v5460_v7, %v5448_v25  ;;  %v4719_v45 = vld [vmem:[%s6110_s3 + $0xe0] ss:$8 sps:$4 sm:$0xff]   ;;  %v4739_v63 = vld [vmem:[%s6110_s3 + $0x144] ss:$8 sps:$4 sm:$0xff]  }
 0x195   :  { %1566 = vmatprep.mubr.bf16.mxu1 %v4798_v1  ;;  %1733 = vmatpush1.bf16.msra.mxu1 %v4713_v23  ;;  %v1403_v9 = vpack.c.bf16 %v5458_v29, %v5460_v7  ;;  %v1613_v20 = vld [vmem:[#allocation3 + $0x2] sm:$0xff]  ;;  %v4742_v46 = vld [vmem:[%s6110_s3 + $0x154] ss:$8 sps:$4 sm:$0xff]   ;;  %v4740_v11 = vld [vmem:[%s6110_s3 + $0x150] ss:$8 sps:$4 sm:$0xff]  }
 0x196   :  { %v1382_v39 = vmax.f32 %v1376_v18, %v1377_v34  ;;  %1389 = vst [vmem:[#allocation3 + $0x30] sm:$0xff] %v5470_v35  ;;  %1734 = vmatprep.subr.bf16.mxu1 %v4718_v31  ;;  %v1383_v40 = vmax.f32 %v1378_v32, %v1379_v33  ;;  %v2362_v42 = vpack.c.bf16 %v5470_v35, %v5458_v29  ;;  %v4745_v14 = vld [vmem:[%s6110_s3 + $0x164] ss:$8 sps:$4 sm:$0xff]   ;;  %v4743_v4 = vld [vmem:[%s6110_s3 + $0x160] ss:$8 sps:$4 sm:$0xff]   ;;  %v2757_v29 = vld [vmem:[%s6112_s5 + $0x18] sm:$0xff] }
 0x197   :  { %v1622_v55 = vpack.c.bf16 %v1614_v13, %v1613_v20  ;;  %v4748_v22 = vld [vmem:[%s6110_s3 + $0x174] ss:$8 sps:$4 sm:$0xff]   ;;  %v4746_v3 = vld [vmem:[%s6110_s3 + $0x170] ss:$8 sps:$4 sm:$0xff]   ;;  %v4751_v26 = vld [vmem:[%s6110_s3 + $0x184] ss:$8 sps:$4 sm:$0xff]  }
 0x198   :  { %v5484_v43 = vmax.f32 %v1382_v39, 0.0  ;;  %v5486_v44 = vmax.f32 %v1383_v40, 0.0  ;;  %v1860_v28 = vld [vmem:[#allocation3 + $0xc] sm:$0xff]  ;;  %v1859_v16 = vld [vmem:[#allocation3 + $0x4] sm:$0xff]  ;;  %v4754_v10 = vld [vmem:[%s6110_s3 + $0x194] ss:$8 sps:$4 sm:$0xff]  }
 0x199   :  { %1735 = vmatpush1.bf16.msra.mxu1 %v4716_v36  ;;  %v1615_v59 = vld [vmem:[#allocation3 + $0x12] sm:$0xff]  ;;  %v1616_v60 = vld [vmem:[#allocation3 + $0x1a] sm:$0xff]  ;;  %v1868_v32 = vpack.c.bf16 %v1860_v28, %v1859_v16  ;;  %v4757_v18 = vld [vmem:[%s6110_s3 + $0x1a4] ss:$8 sps:$4 sm:$0xff]  }
 0x19a   :  { %1390 = vst [vmem:[#allocation3 + $0x38] sm:$0xff] %v5484_v43  ;;  %v1404_v47 = vpack.c.bf16 %v5484_v43, %v5470_v35  ;;  %1736 = vmatprep.subr.bf16.mxu1 %v4721_v37  ;;  %1391 = vst [vmem:[#allocation3 + $0x40] sm:$0xff] %v5486_v44  ;;  %v2363_v50 = vpack.c.bf16 %v5486_v44, %v5484_v43  ;;  %v1405_v12 = vpack.c.bf16 %v5486_v44, %v5486_v44  ;;  %v4749_v31 = vld [vmem:[%s6110_s3 + $0x180] ss:$8 sps:$4 sm:$0xff]   ;;  %v4752_v15 = vld [vmem:[%s6110_s3 + $0x190] ss:$8 sps:$4 sm:$0xff]  }
 0x19b   :  { %v1623_v62 = vpack.c.bf16 %v1616_v60, %v1615_v59  ;;  %v1617_v0 = vld [vmem:[#allocation3 + $0x22] sm:$0xff]  ;;  %v1861_v33 = vld [vmem:[#allocation3 + $0x14] sm:$0xff] }
 0x19c   :  { %1567 = vmatmul.mubr.bf16.gmra.mrb[28].mxu1 %v1403_v9  ;;  %v1862_v34 = vld [vmem:[#allocation3 + $0x1c] sm:$0xff]  ;;  %v4758_v40 = vld [vmem:[%s6110_s3 + $0x1b0] ss:$8 sps:$4 sm:$0xff]   ;;  %v1863_v9 = vld [vmem:[#allocation3 + $0x24] sm:$0xff] }
 0x19d   :  { %1576 = vmatprep.mubr.bf16.mxu1 %v4798_v1  ;;  %1737 = vmatpush1.bf16.msra.mxu1 %v4719_v45  ;;  %v1618_v2 = vld [vmem:[#allocation3 + $0x2a] sm:$0xff]  ;;  %v1869_v39 = vpack.c.bf16 %v1862_v34, %v1861_v33  ;;  %v4760_v37 = vld [vmem:[%s6110_s3 + $0x1b4] ss:$8 sps:$4 sm:$0xff]   ;;  %v2754_v27 = vld [vmem:[%s6112_s5] sm:$0xff] }
 0x19e   :  { %1738 = vmatprep.subr.bf16.mxu1 %v4724_v49  ;;  %v1624_v8 = vpack.c.bf16 %v1618_v2, %v1617_v0  ;;  %v4755_v36 = vld [vmem:[%s6110_s3 + $0x1a0] ss:$8 sps:$4 sm:$0xff]   ;;  %v4763_v45 = vld [vmem:[%s6110_s3 + $0x1c4] ss:$8 sps:$4 sm:$0xff]   ;;  %v4778_v0 = vld [vmem:[%s6110_s3 + $0x214] ss:$8 sps:$4 sm:$0xff]  }
 0x19f   :  { %v4761_v49 = vld [vmem:[%s6110_s3 + $0x1c0] ss:$8 sps:$4 sm:$0xff]   ;;  %v4769_v13 = vld [vmem:[%s6110_s3 + $0x1e4] ss:$8 sps:$4 sm:$0xff]   ;;  %v4776_v2 = vld [vmem:[%s6110_s3 + $0x210] ss:$8 sps:$4 sm:$0xff]  }
 0x1a0   :  { %v4775_v59 = vld [vmem:[%s6110_s3 + $0x204] ss:$8 sps:$4 sm:$0xff]   ;;  %v2760_v43 = vld [vmem:[%s6112_s5 + $0x30] sm:$0xff]  ;;  %v2761_v44 = vld [vmem:[%s6112_s5 + $0x38] sm:$0xff] }
 0x1a1   :  { %1739 = vmatpush1.bf16.msra.mxu1 %v4722_v52  ;;  %v1619_v17 = vld [vmem:[#allocation3 + $0x32] sm:$0xff]  ;;  %v1620_v19 = vld [vmem:[#allocation3 + $0x3a] sm:$0xff]  ;;  %v1621_v23 = vld [vmem:[#allocation3 + $0x42] sm:$0xff] }
 0x1a2   :  { %1970 = vmatprep.subr.bf16.mxu1 %v4727_v53  ;;  %v1625_v24 = vpack.c.bf16 %v1620_v19, %v1619_v17  ;;  %v1626_v6 = vpack.c.bf16 %v1621_v23, %v1621_v23  ;;  %v4766_v53 = vld [vmem:[%s6110_s3 + $0x1d4] ss:$8 sps:$4 sm:$0xff]   ;;  %v1867_v60 = vld [vmem:[#allocation3 + $0x44] sm:$0xff]  ;;  %v4782_v19 = vld [vmem:[%s6110_s3 + $0x230] ss:$8 sps:$4 sm:$0xff]  }
 0x1a3   :  { %v1865_v20 = vld [vmem:[#allocation3 + $0x34] sm:$0xff]  ;;  %v4793_v28 = vld [vmem:[%s6110_s3 + $0x264] ss:$8 sps:$4 sm:$0xff]  }
 0x1a4   :  { %1577 = vmatmul.mubr.bf16.gmra.mrb[32].mxu1 %v1404_v47  ;;  %v1864_v47 = vld [vmem:[#allocation3 + $0x2c] sm:$0xff]  ;;  %v4784_v17 = vld [vmem:[%s6110_s3 + $0x234] ss:$8 sps:$4 sm:$0xff]   ;;  %v2758_v35 = vld [vmem:[%s6112_s5 + $0x20] sm:$0xff] }
 0x1a5   :  { %1586 = vmatprep.mubr.bf16.mxu1 %v4798_v1  ;;  %v1870_v52 = vpack.c.bf16 %v1864_v47, %v1863_v9  ;;  %v4790_v23 = vld [vmem:[%s6110_s3 + $0x254] ss:$8 sps:$4 sm:$0xff]   ;;  %v2113_v33 = vld [vmem:[#allocation3 + $0x46] sm:$0xff] }
 0x1a6   :  { %v2111_v16 = vld [vmem:[#allocation3 + $0x36] sm:$0xff]  ;;  %v2118_v34 = vpack.c.bf16 %v2113_v33, %v2113_v33  ;;  %v2766_v47 = vld [vmem:[%s6112_s5 + $0x60] sm:$0xff] }
 0x1ac   :  { %1587 = vmatmul.mubr.bf16.gmra.mrb[36].mxu1 %v1405_v12  ;;  %v4764_v12 = vld [vmem:[%s6110_s3 + $0x1d0] ss:$8 sps:$4 sm:$0xff]  }
 0x1ad   :  { %1756 = vmatprep.mubr.bf16.mxu1 %v4798_v1 }
 0x1b4   :  { %1757 = vmatmul.mubr.bf16.vlgmr.msra.gmra.mrb[20].mxu1 %v1622_v55  ;;  %v4767_v55 = vld [vmem:[%s6110_s3 + $0x1e0] ss:$8 sps:$4 sm:$0xff]  }
 0x1b5   :  { %1971 = vmatpush1.bf16.msra.mxu1 %v4725_v54  ;;  %1766 = vmatprep.mubr.bf16.mxu1 %v4798_v1  ;;  %v1866_v54 = vld [vmem:[#allocation3 + $0x3c] sm:$0xff] }
 0x1b6   :  { %1972 = vmatprep.subr.bf16.mxu1 %v4730_v56  ;;  %v1871_v56 = vpack.c.bf16 %v1866_v54, %v1865_v20  ;;  %v4351_v20 = vld [vmem:[#allocation4] sm:$0xff]  ;;  %v4354_v54 = vld [vmem:[#allocation4 + $0x8] sm:$0xff] }
 0x1b9   :  { %1973 = vmatpush1.bf16.msra.mxu1 %v4728_v51  ;;  %v4772_v51 = vld [vmem:[%s6110_s3 + $0x1f4] ss:$8 sps:$4 sm:$0xff]  }
 0x1ba   :  { %1974 = vmatprep.subr.bf16.mxu1 %v4733_v57  ;;  %v4770_v57 = vld [vmem:[%s6110_s3 + $0x1f0] ss:$8 sps:$4 sm:$0xff]  }
 0x1bc   :  { %1767 = vmatmul.mubr.bf16.gmra.mrb[24].mxu1 %v1623_v62  ;;  %v2106_v62 = vld [vmem:[#allocation3 + $0xe] sm:$0xff] }
 0x1bd   :  { %1975 = vmatpush1.bf16.msra.mxu1 %v4731_v61  ;;  %1776 = vmatprep.mubr.bf16.mxu1 %v4798_v1  ;;  %v1872_v61 = vpack.c.bf16 %v1867_v60, %v1867_v60 }
 0x1be   :  { %1976 = vmatprep.subr.bf16.mxu1 %v4736_v58  ;;  %v2105_v58 = vld [vmem:[#allocation3 + $0x6] sm:$0xff] }
 0x1c1   :  { %1977 = vmatpush1.bf16.msra.mxu1 %v4734_v41  ;;  %v4773_v41 = vld [vmem:[%s6110_s3 + $0x200] ss:$8 sps:$4 sm:$0xff]  }
 0x1c2   :  { %1978 = vmatprep.subr.bf16.mxu1 %v4739_v63  ;;  %v2114_v63 = vpack.c.bf16 %v2106_v62, %v2105_v58 }
 0x1c4   :  { %1777 = vmatmul.mubr.bf16.gmra.mrb[28].mxu1 %v1624_v8  ;;  %v2107_v8 = vld [vmem:[#allocation3 + $0x16] sm:$0xff] }
 0x1c5   :  { %1979 = vmatpush1.bf16.msra.mxu1 %v4737_v5  ;;  %1786 = vmatprep.mubr.bf16.mxu1 %v4798_v1  ;;  %v4781_v5 = vld [vmem:[%s6110_s3 + $0x224] ss:$8 sps:$4 sm:$0xff]  }
 0x1c6   :  { %1980 = vmatprep.subr.bf16.mxu1 %v4742_v46  ;;  %v2108_v46 = vld [vmem:[#allocation3 + $0x1e] sm:$0xff] }
 0x1c9   :  { %1981 = vmatpush1.bf16.msra.mxu1 %v4740_v11  ;;  %v4779_v11 = vld [vmem:[%s6110_s3 + $0x220] ss:$8 sps:$4 sm:$0xff]  }
 0x1ca   :  { %1982 = vmatprep.subr.bf16.mxu1 %v4745_v14  ;;  %v2115_v14 = vpack.c.bf16 %v2108_v46, %v2107_v8  ;;  %v4372_v46 = vld [vmem:[#allocation4 + $0x38] sm:$0xff] }
 0x1cc   :  { %1787 = vmatmul.mubr.bf16.gmra.mrb[32].mxu1 %v1625_v24  ;;  %v2109_v24 = vld [vmem:[#allocation3 + $0x26] sm:$0xff] }
 0x1cd   :  { %1796 = vmatprep.mubr.bf16.mxu1 %v4798_v1  ;;  %1983 = vmatpush1.bf16.msra.mxu1 %v4743_v4  ;;  %v4787_v4 = vld [vmem:[%s6110_s3 + $0x244] ss:$8 sps:$4 sm:$0xff]  }
 0x1ce   :  { %1984 = vmatprep.subr.bf16.mxu1 %v4748_v22  ;;  %v2110_v22 = vld [vmem:[#allocation3 + $0x2e] sm:$0xff] }
 0x1d1   :  { %1985 = vmatpush1.bf16.msra.mxu1 %v4746_v3  ;;  %v4785_v3 = vld [vmem:[%s6110_s3 + $0x240] ss:$8 sps:$4 sm:$0xff]  }
 0x1d2   :  { %2216 = vmatprep.subr.bf16.mxu1 %v4751_v26  ;;  %v2116_v26 = vpack.c.bf16 %v2110_v22, %v2109_v24 }
 0x1d4   :  { %1797 = vmatmul.mubr.bf16.gmra.mrb[36].mxu1 %v1626_v6  ;;  %v4788_v6 = vld [vmem:[%s6110_s3 + $0x250] ss:$8 sps:$4 sm:$0xff]  }
 0x1d5   :  { %2002 = vmatprep.mubr.bf16.mxu1 %v4798_v1 }
 0x1dc   :  { %2003 = vmatmul.mubr.bf16.vlgmr.msra.gmra.mrb[20].mxu1 %v1868_v32  ;;  %v4791_v32 = vld [vmem:[%s6110_s3 + $0x260] ss:$8 sps:$4 sm:$0xff]  }
 0x1dd   :  { %2217 = vmatpush1.bf16.msra.mxu1 %v4749_v31  ;;  %2012 = vmatprep.mubr.bf16.mxu1 %v4798_v1  ;;  %v2112_v31 = vld [vmem:[#allocation3 + $0x3e] sm:$0xff] }
 0x1de   :  { %2218 = vmatprep.subr.bf16.mxu1 %v4754_v10  ;;  %v2117_v10 = vpack.c.bf16 %v2112_v31, %v2111_v16 }
 0x1e1   :  { %2219 = vmatpush1.bf16.msra.mxu1 %v4752_v15  ;;  %v4796_v15 = vld [vmem:[%s6110_s3 + $0x274] ss:$8 sps:$4 sm:$0xff]  }
 0x1e2   :  { %2220 = vmatprep.subr.bf16.mxu1 %v4757_v18  ;;  %v4794_v18 = vld [vmem:[%s6110_s3 + $0x270] ss:$8 sps:$4 sm:$0xff]  }
 0x1e4   :  { %2013 = vmatmul.mubr.bf16.gmra.mrb[24].mxu1 %v1869_v39  ;;  %v2763_v39 = vld [vmem:[%s6112_s5 + $0x48] sm:$0xff] }
 0x1e5   :  { %2221 = vmatpush1.bf16.msra.mxu1 %v4755_v36  ;;  %2022 = vmatprep.mubr.bf16.mxu1 %v4798_v1  ;;  %v2762_v36 = vld [vmem:[%s6112_s5 + $0x40] sm:$0xff] }
 0x1e6   :  { %2222 = vmatprep.subr.bf16.mxu1 %v4760_v37  ;;  %v4135_v37 = vpack.c.bf16 %v2763_v39, %v2762_v36  ;;  %v4384_v36 = vld [vmem:[#allocation4 + $0x58] sm:$0xff] }
 0x1e9   :  { %2223 = vmatpush1.bf16.msra.mxu1 %v4758_v40  ;;  %v2764_v40 = vld [vmem:[%s6112_s5 + $0x50] sm:$0xff] }
 0x1ea   :  { %2224 = vmatprep.subr.bf16.mxu1 %v4763_v45  ;;  %v2765_v45 = vld [vmem:[%s6112_s5 + $0x58] sm:$0xff] }
 0x1eb   :  { %v4138_v9 = vpack.c.bf16 %v2765_v45, %v2764_v40 }
 0x1ec   :  { %2023 = vmatmul.mubr.bf16.gmra.mrb[28].mxu1 %v1870_v52 }
 0x1ed   :  { %2225 = vmatpush1.bf16.msra.mxu1 %v4761_v49  ;;  %2032 = vmatprep.mubr.bf16.mxu1 %v4798_v1  ;;  %v2767_v49 = vld [vmem:[%s6112_s5 + $0x68] sm:$0xff] }
 0x1ee   :  { %2226 = vmatprep.subr.bf16.mxu1 %v4766_v53  ;;  %v4141_v52 = vpack.c.bf16 %v2767_v49, %v2766_v47  ;;  %v2768_v53 = vld [vmem:[%s6112_s5 + $0x70] sm:$0xff] }
 0x1f1   :  { %2227 = vmatpush1.bf16.msra.mxu1 %v4764_v12  ;;  %v2769_v12 = vld [vmem:[%s6112_s5 + $0x78] sm:$0xff] }
 0x1f2   :  { %2228 = vmatprep.subr.bf16.mxu1 %v4769_v13  ;;  %v4144_v13 = vpack.c.bf16 %v2769_v12, %v2768_v53 }
 0x1f4   :  { %2033 = vmatmul.mubr.bf16.gmra.mrb[32].mxu1 %v1871_v56  ;;  %v4357_v56 = vld [vmem:[#allocation4 + $0x10] sm:$0xff] }
 0x1f5   :  { %2042 = vmatprep.mubr.bf16.mxu1 %v4798_v1  ;;  %2229 = vmatpush1.bf16.msra.mxu1 %v4767_v55 }
 0x1f6   :  { %2230 = vmatprep.subr.bf16.mxu1 %v4772_v51 }
 0x1f9   :  { %2231 = vmatpush1.bf16.msra.mxu1 %v4770_v57 }
 0x1fa   :  { %2462 = vmatprep.subr.bf16.mxu1 %v4775_v59  ;;  %v4360_v59 = vld [vmem:[#allocation4 + $0x18] sm:$0xff] }
 0x1fc   :  { %2043 = vmatmul.mubr.bf16.gmra.mrb[36].mxu1 %v1872_v61 }
 0x1fd   :  { %2248 = vmatprep.mubr.bf16.mxu1 %v4798_v1 }
 0x204   :  { %2249 = vmatmul.mubr.bf16.vlgmr.msra.gmra.mrb[20].mxu1 %v2114_v63  ;;  %v4366_v63 = vld [vmem:[#allocation4 + $0x28] sm:$0xff] }
 0x205   :  { %2463 = vmatpush1.bf16.msra.mxu1 %v4773_v41  ;;  %2258 = vmatprep.mubr.bf16.mxu1 %v4798_v1 }
 0x206   :  { %2464 = vmatprep.subr.bf16.mxu1 %v4778_v0 }
 0x209   :  { %2465 = vmatpush1.bf16.msra.mxu1 %v4776_v2  ;;  %v4369_v2 = vld [vmem:[#allocation4 + $0x30] sm:$0xff] }
 0x20a   :  { %2466 = vmatprep.subr.bf16.mxu1 %v4781_v5 }
 0x20c   :  { %2259 = vmatmul.mubr.bf16.gmra.mrb[24].mxu1 %v2115_v14 }
 0x20d   :  { %2467 = vmatpush1.bf16.msra.mxu1 %v4779_v11  ;;  %2268 = vmatprep.mubr.bf16.mxu1 %v4798_v1 }
 0x20e   :  { %2468 = vmatprep.subr.bf16.mxu1 %v4784_v17 }
 0x211   :  { %2469 = vmatpush1.bf16.msra.mxu1 %v4782_v19 }
 0x212   :  { %2470 = vmatprep.subr.bf16.mxu1 %v4787_v4 }
 0x214   :  { %2269 = vmatmul.mubr.bf16.gmra.mrb[28].mxu1 %v2116_v26 }
 0x215   :  { %2471 = vmatpush1.bf16.msra.mxu1 %v4785_v3  ;;  %2278 = vmatprep.mubr.bf16.mxu1 %v4798_v1 }
 0x216   :  { %2472 = vmatprep.subr.bf16.mxu1 %v4790_v23 }
 0x219   :  { %2473 = vmatpush1.bf16.msra.mxu1 %v4788_v6 }
 0x21a   :  { %2474 = vmatprep.subr.bf16.mxu1 %v4793_v28 }
 0x21c   :  { %2279 = vmatmul.mubr.bf16.gmra.mrb[32].mxu1 %v2117_v10 }
 0x21d   :  { %2288 = vmatprep.mubr.bf16.mxu1 %v4798_v1  ;;  %2475 = vmatpush1.bf16.msra.mxu1 %v4791_v32 }
 0x21e   :  { %2476 = vmatprep.subr.bf16.mxu1 %v4796_v15 }
 0x221   :  { %2477 = vmatpush1.bf16.msra.mxu1 %v4794_v18 }
 0x222   :  { %4242 = vmatprep.subr.bf16.mxu1 %v4800_v21 }
 0x224   :  { %2289 = vmatmul.mubr.bf16.gmra.mrb[36].mxu1 %v2118_v34 }
 0x225   :  { %2494 = vmatprep.mubr.bf16.mxu1 %v4798_v1 }
 0x22c   :  { %2495 = vmatmul.mubr.bf16.vlgmr.msra.gmra.mrb[20].mxu1 %v2360_v30  ;;  %v2755_v30 = vld [vmem:[%s6112_s5 + $0x8] sm:$0xff] }
 0x22d   :  { %2504 = vmatprep.mubr.bf16.mxu1 %v4798_v1  ;;  %v4123_v25 = vpack.c.bf16 %v2755_v30, %v2754_v27  ;;  %v4375_v27 = vld [vmem:[#allocation4 + $0x40] sm:$0xff] }
 0x22f   :  { %4124 = vmatpush3.bf16.msra.mxu0 %v4123_v25 }
 0x230   :  { %4125 = vmatprep.subr.bf16.mxu0 %v4800_v21 }
 0x234   :  { %2505 = vmatmul.mubr.bf16.gmra.mrb[24].mxu1 %v2361_v38  ;;  %v2759_v38 = vld [vmem:[%s6112_s5 + $0x28] sm:$0xff] }
 0x235   :  { %2514 = vmatprep.mubr.bf16.mxu1 %v4798_v1 }
 0x23c   :  { %2515 = vmatmul.mubr.bf16.gmra.mrb[28].mxu1 %v2362_v42  ;;  %v4129_v42 = vpack.c.bf16 %v2759_v38, %v2758_v35 }
 0x23d   :  { %2524 = vmatprep.mubr.bf16.mxu1 %v4798_v1 }
 0x244   :  { %2525 = vmatmul.mubr.bf16.gmra.mrb[32].mxu1 %v2363_v50  ;;  %v4132_v50 = vpack.c.bf16 %v2761_v44, %v2760_v43 }
 0x245   :  { %2534 = vmatprep.mubr.bf16.mxu1 %v4798_v1  ;;  %v2756_v1 = vld [vmem:[%s6112_s5 + $0x10] sm:$0xff] }
 0x246   :  { %v4126_v7 = vpack.c.bf16 %v2757_v29, %v2756_v1  ;;  %v4378_v1 = vld [vmem:[#allocation4 + $0x48] sm:$0xff] }
 0x248   :  { %4127 = vmatpush3.bf16.msra.mxu0 %v4126_v7 }
 0x249   :  { %4128 = vmatprep.subr.bf16.mxu0 %v4800_v21 }
 0x24c   :  { %2535 = vmatmul.mubr.bf16.gmra.mrb[36].mxu1 %v4800_v21  ;;  %4130 = vmatpush3.bf16.msra.mxu0 %v4129_v42  ;;  %v4381_v42 = vld [vmem:[#allocation4 + $0x50] sm:$0xff] }
 0x24d   :  { %4131 = vmatprep.subr.bf16.mxu0 %v4800_v21  ;;  %4094 = vmatprep.mubr.msk.f32.mxu1 %vm4801_vm1, %v4799_v48  ;;  %v4363_v48 = vld [vmem:[#allocation4 + $0x20] sm:$0xff] }
 0x250   :  { %4133 = vmatpush3.bf16.msra.mxu0 %v4132_v50 }
 0x251   :  { %4134 = vmatprep.subr.bf16.mxu0 %v4800_v21 }
 0x254   :  { %4136 = vmatpush3.bf16.msra.mxu0 %v4135_v37 }
 0x255   :  { %4137 = vmatprep.subr.bf16.mxu0 %v4800_v21 }
 0x258   :  { %4139 = vmatpush3.bf16.msra.mxu0 %v4138_v9 }
 0x259   :  { %4140 = vmatprep.subr.bf16.mxu0 %v4800_v21 }
 0x25c   :  { %4142 = vmatpush3.bf16.msra.mxu0 %v4141_v52 }
 0x25d   :  { %4143 = vmatprep.subr.bf16.mxu0 %v4800_v21 }
 0x260   :  { %4145 = vmatpush3.bf16.msra.mxu0 %v4144_v13 }
 0x261   :  { %4146 = vmatprep.subr.bf16.mxu0 %v4800_v21 }
 0x2ff   :  { %v2496_v55 = vpop.f32.mrb[20].mxu1 }
 0x300   :  { %v4352_v51 = vadd.f32 %v4351_v20, %v2496_v55  ;;  %v2498_v57 = vpop.f32.mrb[21].mxu1  ;;  %v4387_v20 = vld [vmem:[#allocation4 + $0x60] sm:$0xff]  ;;  %v4390_v55 = vld [vmem:[#allocation4 + $0x68] sm:$0xff] }
 0x301   :  { %v4355_v60 = vadd.f32 %v4354_v54, %v2498_v57  ;;  %v2500_v61 = vpop.f32.mrb[22].mxu1 }
 0x302   :  { %2579 = vst [vmem:[#allocation4] sm:$0xff] %v4352_v51  ;;  %v4358_v62 = vadd.f32 %v4357_v56, %v2500_v61  ;;  %v2502_v58 = vpop.f32.mrb[23].mxu1 }
 0x303   :  { %2580 = vst [vmem:[#allocation4 + $0x8] sm:$0xff] %v4355_v60  ;;  %v4361_v41 = vadd.f32 %v4360_v59, %v2502_v58 }
 0x304   :  { %2581 = vst [vmem:[#allocation4 + $0x10] sm:$0xff] %v4358_v62  ;;  %v2621_v24 = vrot.slane %v4358_v62, 2 }
 0x305   :  { %2582 = vst [vmem:[#allocation4 + $0x18] sm:$0xff] %v4361_v41  ;;  %v2624_v6 = vrot.slane %v4361_v41, 2 }
 0x307   :  { %v2506_v0 = vpop.f32.mrb[24].mxu1 }
 0x308   :  { %v4364_v5 = vadd.f32 %v4363_v48, %v2506_v0  ;;  %v2508_v8 = vpop.f32.mrb[25].mxu1 }
 0x309   :  { %v2605_v11 = vld [vmem:[#allocation4] sm:$0xfc]  ;;  %v4367_v14 = vadd.f32 %v4366_v63, %v2508_v8  ;;  %v2510_v17 = vpop.f32.mrb[26].mxu1 }
 0x30a   :  { %v2620_v19 = vrot.slane %v2605_v11, 2  ;;  %v2606_v4 = vld [vmem:[#allocation4 + $0x8] sm:$0xfc]  ;;  %2583 = vst [vmem:[#allocation4 + $0x20] sm:$0xff] %v4364_v5  ;;  %v2626_v22 = vrot.slane %v4364_v5, 2  ;;  %v4370_v3 = vadd.f32 %v4369_v2, %v2510_v17  ;;  %v2512_v26 = vpop.f32.mrb[27].mxu1 }
 0x30b   :  { %v2623_v23 = vrot.slane %v2606_v4, 2  ;;  %2584 = vst [vmem:[#allocation4 + $0x28] sm:$0xff] %v4367_v14  ;;  %v2628_v28 = vrot.slane %v4367_v14, 2  ;;  %v4373_v16 = vadd.f32 %v4372_v46, %v2512_v26  ;;  %v4399_v17 = vld [vmem:[#allocation4 + $0x80] sm:$0xff] }
 0x30c   :  { %v2622_v31 = vsel %vm2619_vm2, %v2620_v19, %v2621_v24  ;;  %v2627_v32 = vsel %vm2619_vm2, %v2621_v24, %v2626_v22  ;;  %2585 = vst [vmem:[#allocation4 + $0x30] sm:$0xff] %v4370_v3  ;;  %v2630_v10 = vrot.slane %v4370_v3, 2  ;;  %v4402_v24 = vld [vmem:[#allocation4 + $0x88] sm:$0xff] }
 0x30d   :  { %v2646_v15 = vmax.f32 %v4352_v51, %v2622_v31  ;;  %v2625_v18 = vsel %vm2619_vm2, %v2623_v23, %v2624_v6  ;;  %v2629_v33 = vsel %vm2619_vm2, %v2624_v6, %v2628_v28  ;;  %2586 = vst [vmem:[#allocation4 + $0x38] sm:$0xff] %v4373_v16  ;;  %v2632_v34 = vrot.slane %v4373_v16, 2  ;;  %v4393_v51 = vld [vmem:[#allocation4 + $0x70] sm:$0xff] }
 0x30e   :  { %v2647_v30 = vmax.f32 %v4355_v60, %v2625_v18  ;;  %v2631_v25 = vsel %vm2619_vm2, %v2626_v22, %v2630_v10  ;;  %v2648_v29 = vmax.f32 %v4358_v62, %v2627_v32  ;;  %v2649_v7 = vmax.f32 %v4361_v41, %v2629_v33  ;;  %v4396_v60 = vld [vmem:[#allocation4 + $0x78] sm:$0xff] }
 0x30f   :  { %v2633_v35 = vsel %vm2619_vm2, %v2628_v28, %v2632_v34  ;;  %v2516_v38 = vpop.f32.mrb[28].mxu1  ;;  %v2650_v43 = vmax.f32 %v4364_v5, %v2631_v25 }
 0x310   :  { %v4376_v44 = vadd.f32 %v4375_v27, %v2516_v38  ;;  %v2518_v50 = vpop.f32.mrb[29].mxu1  ;;  %v2654_v39 = vmax.f32 %v2646_v15, %v2647_v30  ;;  %v2655_v37 = vmax.f32 %v2648_v29, %v2649_v7  ;;  %v2651_v40 = vmax.f32 %v4367_v14, %v2633_v35 }
 0x311   :  { %v4379_v45 = vadd.f32 %v4378_v1, %v2518_v50  ;;  %v2520_v9 = vpop.f32.mrb[30].mxu1  ;;  %v3708_v50 = vld [vmem:[%s6112_s5 + $0x88] sm:$0xff] }
 0x312   :  { %2587 = vst [vmem:[#allocation4 + $0x40] sm:$0xff] %v4376_v44  ;;  %v4382_v47 = vadd.f32 %v4381_v42, %v2520_v9  ;;  %v2522_v49 = vpop.f32.mrb[31].mxu1  ;;  %v2658_v52 = vmax.f32 %v2654_v39, 0.0  ;;  %v2659_v53 = vmax.f32 %v2655_v37, 0.0  ;;  %v2656_v13 = vmax.f32 %v2650_v43, %v2651_v40  ;;  %v3707_v44 = vld [vmem:[%s6112_s5 + $0x80] sm:$0xff]  ;;  %v3710_v9 = vld [vmem:[%s6112_s5 + $0x98] sm:$0xff] }
 0x313   :  { %2588 = vst [vmem:[#allocation4 + $0x48] sm:$0xff] %v4379_v45  ;;  %v4385_v12 = vadd.f32 %v4384_v36, %v2522_v49  ;;  %v4147_v37 = vpack.c.bf16 %v3708_v50, %v3707_v44  ;;  %v3709_v45 = vld [vmem:[%s6112_s5 + $0x90] sm:$0xff]  ;;  %v3730_v50 = vld [vmem:[%s6112_s5 + $0x138] sm:$0xff] }
 0x314   :  { %2589 = vst [vmem:[#allocation4 + $0x50] sm:$0xff] %v4382_v47  ;;  %2662 = vst [vmem:[#allocation5] sm:$0xff] %v2658_v52  ;;  %v2660_v54 = vmax.f32 %v2656_v13, 0.0  ;;  %v4150_v49 = vpack.c.bf16 %v3710_v9, %v3709_v45  ;;  %v5773_v52 = vld [vmem:[#allocation2 + $0x90] sm:$0xff]  ;;  %v3734_v9 = vld [vmem:[%s6112_s5 + $0x158] sm:$0xff] }
 0x315   :  { %2663 = vst [vmem:[#allocation5 + $0x8] sm:$0xff] %v2659_v53  ;;  %2590 = vst [vmem:[#allocation4 + $0x58] sm:$0xff] %v4385_v12  ;;  %v3218_v53 = vld [vmem:[%s6113_s7] sm:$0xff]  ;;  %v3220_v13 = vld [vmem:[%s6113_s7 + $0x10] sm:$0xff] }
 0x316   :  { %2664 = vst [vmem:[#allocation5 + $0x10] sm:$0xff] %v2660_v54  ;;  %v3712_v54 = vld [vmem:[%s6112_s5 + $0xa8] sm:$0xff]  ;;  %v3729_v44 = vld [vmem:[%s6112_s5 + $0x130] sm:$0xff]  ;;  %3411 = vst [vmem:[%s6116_s11] sm:$0xff] %v5773_v52 }
 0x317   :  { %v2526_v56 = vpop.f32.mrb[32].mxu1  ;;  %v3733_v45 = vld [vmem:[%s6112_s5 + $0x150] sm:$0xff] }
 0x318   :  { %v4388_v57 = vadd.f32 %v4387_v20, %v2526_v56  ;;  %v2528_v59 = vpop.f32.mrb[33].mxu1  ;;  %v3711_v20 = vld [vmem:[%s6112_s5 + $0xa0] sm:$0xff]  ;;  %v3221_v56 = vld [vmem:[%s6113_s7 + $0x18] sm:$0xff] }
 0x319   :  { %v4391_v61 = vadd.f32 %v4390_v55, %v2528_v59  ;;  %v2530_v62 = vpop.f32.mrb[34].mxu1  ;;  %v3222_v59 = vld [vmem:[%s6113_s7 + $0x20] sm:$0xff] }
 0x31a   :  { %2591 = vst [vmem:[#allocation4 + $0x60] sm:$0xff] %v4388_v57  ;;  %v4394_v58 = vadd.f32 %v4393_v51, %v2530_v62  ;;  %v2532_v41 = vpop.f32.mrb[35].mxu1  ;;  %v2695_v63 = vrot.slane %v4388_v57, 2  ;;  %v4246_v51 = vpack.c.bf16 %v3221_v56, %v3220_v13  ;;  %v3714_v62 = vld [vmem:[%s6112_s5 + $0xb8] sm:$0xff]  ;;  %v3737_v13 = vld [vmem:[%s6112_s5 + $0x170] sm:$0xff]  ;;  %v3739_v56 = vld [vmem:[%s6112_s5 + $0x180] sm:$0xff] }
 0x31b   :  { %v2674_v48 = vld [vmem:[#allocation4 + $0x50] sm:$0xfc]  ;;  %2592 = vst [vmem:[#allocation4 + $0x68] sm:$0xff] %v4391_v61  ;;  %v4397_v0 = vadd.f32 %v4396_v60, %v2532_v41  ;;  %v2698_v8 = vrot.slane %v4391_v61, 2  ;;  %v2747_v40 = vld [vmem:[#allocation5] sm:$0x1] }
 0x31c   :  { %v2694_v2 = vrot.slane %v2674_v48, 2  ;;  %v2675_v5 = vld [vmem:[#allocation4 + $0x58] sm:$0xfc]  ;;  %2593 = vst [vmem:[#allocation4 + $0x70] sm:$0xff] %v4394_v58  ;;  %v2700_v46 = vrot.slane %v4394_v58, 2  ;;  %v3224_v48 = vld [vmem:[%s6113_s7 + $0x30] sm:$0xff] }
 0x31d   :  { %v2697_v11 = vrot.slane %v2675_v5, 2  ;;  %2594 = vst [vmem:[#allocation4 + $0x78] sm:$0xff] %v4397_v0  ;;  %v2702_v14 = vrot.slane %v4397_v0, 2  ;;  %v3223_v60 = vld [vmem:[%s6113_s7 + $0x28] sm:$0xff] }
 0x31e   :  { %v2696_v19 = vsel %vm2619_vm2, %v2694_v2, %v2695_v63  ;;  %v2701_v4 = vsel %vm2619_vm2, %v2695_v63, %v2700_v46  ;;  %v3225_v63 = vld [vmem:[%s6113_s7 + $0x38] sm:$0xff]  ;;  %v3716_v2 = vld [vmem:[%s6112_s5 + $0xc8] sm:$0xff] }
 0x31f   :  { %v2720_v22 = vmax.f32 %v4382_v47, %v2696_v19  ;;  %v2699_v3 = vsel %vm2619_vm2, %v2697_v11, %v2698_v8  ;;  %v2722_v26 = vmax.f32 %v4388_v57, %v2701_v4  ;;  %v2703_v23 = vsel %vm2619_vm2, %v2698_v8, %v2702_v14  ;;  %v2536_v6 = vpop.f32.mrb[36].mxu1  ;;  %v3227_v11 = vld [vmem:[%s6113_s7 + $0x48] sm:$0xff] }
 0x320   :  { %v2721_v28 = vmax.f32 %v4385_v12, %v2699_v3  ;;  %v2723_v16 = vmax.f32 %v4391_v61, %v2703_v23  ;;  %v4400_v31 = vadd.f32 %v4399_v17, %v2536_v6  ;;  %v2538_v32 = vpop.f32.mrb[37].mxu1  ;;  %v3219_v12 = vld [vmem:[%s6113_s7 + $0x8] sm:$0xff]  ;;  %v4153_v57 = vpack.c.bf16 %v3712_v54, %v3711_v20  ;;  %v3713_v61 = vld [vmem:[%s6112_s5 + $0xb0] sm:$0xff]  ;;  %v3718_v17 = vld [vmem:[%s6112_s5 + $0xd8] sm:$0xff] }
 0x321   :  { %v4403_v10 = vadd.f32 %v4402_v24, %v2538_v32  ;;  %v2540_v15 = vpop.f32.mrb[38].mxu1  ;;  %v4243_v55 = vpack.c.bf16 %v3219_v12, %v3218_v53  ;;  %v4156_v41 = vpack.c.bf16 %v3714_v62, %v3713_v61  ;;  %v4252_v5 = vpack.c.bf16 %v3225_v63, %v3224_v48  ;;  %v3228_v24 = vld [vmem:[%s6113_s7 + $0x50] sm:$0xff]  ;;  %v3719_v3 = vld [vmem:[%s6112_s5 + $0xe0] sm:$0xff]  ;;  %v3722_v32 = vld [vmem:[%s6112_s5 + $0xf8] sm:$0xff] }
 0x322   :  { %2595 = vst [vmem:[#allocation4 + $0x80] sm:$0xff] %v4400_v31  ;;  %v2704_v18 = vrot.slane %v4400_v31, 2  ;;  %v2541_v33 = vpop.f32.mrb[39].mxu1  ;;  %v2728_v34 = vmax.f32 %v2720_v22, %v2721_v28  ;;  %v2729_v27 = vmax.f32 %v2722_v26, %v2723_v16  ;;  %v3229_v22 = vld [vmem:[%s6113_s7 + $0x58] sm:$0xff]  ;;  %v3720_v26 = vld [vmem:[%s6112_s5 + $0xe8] sm:$0xff]  ;;  %v3230_v28 = vld [vmem:[%s6113_s7 + $0x60] sm:$0xff] }
 0x323   :  { %2596 = vst [vmem:[#allocation4 + $0x88] sm:$0xff] %v4403_v10  ;;  %v2706_v30 = vrot.slane %v4403_v10, 2  ;;  %4244 = vmatpush3.bf16.msra.mxu1 %v4243_v55  ;;  %v4258_v23 = vpack.c.bf16 %v3229_v22, %v3228_v24  ;;  %v4165_v6 = vpack.c.bf16 %v3720_v26, %v3719_v3  ;;  %v3231_v16 = vld [vmem:[%s6113_s7 + $0x68] sm:$0xff]  ;;  %v3721_v31 = vld [vmem:[%s6112_s5 + $0xf0] sm:$0xff]  ;;  %v3723_v33 = vld [vmem:[%s6112_s5 + $0x100] sm:$0xff] }
 0x324   :  { %v2705_v25 = vsel %vm2619_vm2, %v2700_v46, %v2704_v18  ;;  %v2732_v1 = vmax.f32 %v2728_v34, 0.0  ;;  %v2733_v29 = vmax.f32 %v2729_v27, 0.0  ;;  %4245 = vmatprep.subr.bf16.mxu1 %v4800_v21  ;;  %v3226_v46 = vld [vmem:[%s6113_s7 + $0x40] sm:$0xff]  ;;  %v4261_v15 = vpack.c.bf16 %v3231_v16, %v3230_v28  ;;  %v3724_v34 = vld [vmem:[%s6112_s5 + $0x108] sm:$0xff]  ;;  %v3738_v20 = vld [vmem:[%s6112_s5 + $0x178] sm:$0xff] }
 0x325   :  { %v2724_v7 = vmax.f32 %v4394_v58, %v2705_v25  ;;  %v2707_v35 = vsel %vm2619_vm2, %v2702_v14, %v2706_v30  ;;  %v4249_v58 = vpack.c.bf16 %v3223_v60, %v3222_v59  ;;  %v3717_v14 = vld [vmem:[%s6112_s5 + $0xd0] sm:$0xff]  ;;  %v4255_v19 = vpack.c.bf16 %v3227_v11, %v3226_v46  ;;  %v3736_v53 = vld [vmem:[%s6112_s5 + $0x168] sm:$0xff]  ;;  %v2935_v60 = vld [vmem:[#allocation5 + $0x8] sm:$0x1] }
 0x326   :  { %v2725_v38 = vmax.f32 %v4397_v0, %v2707_v35  ;;  %2736 = vst [vmem:[#allocation5 + $0x28] sm:$0xff] %v2732_v1  ;;  %2737 = vst [vmem:[#allocation5 + $0x30] sm:$0xff] %v2733_v29  ;;  %v3715_v0 = vld [vmem:[%s6112_s5 + $0xc0] sm:$0xff]  ;;  %v4162_v4 = vpack.c.bf16 %v3718_v17, %v3717_v14  ;;  %v4168_v18 = vpack.c.bf16 %v3722_v32, %v3721_v31  ;;  %v2841_v25 = vld [vmem:[#allocation5 + $0x4] sm:$0x1] }
 0x327   :  { %4247 = vmatpush3.bf16.msra.mxu1 %v4246_v51  ;;  %v4159_v8 = vpack.c.bf16 %v3716_v2, %v3715_v0  ;;  %v4171_v30 = vpack.c.bf16 %v3724_v34, %v3723_v33  ;;  %v3725_v1 = vld [vmem:[%s6112_s5 + $0x110] sm:$0xff]  ;;  %v3726_v29 = vld [vmem:[%s6112_s5 + $0x118] sm:$0xff]  ;;  %v4192_v55 = vpack.c.bf16 %v3738_v20, %v3737_v13  ;;  %v3740_v51 = vld [vmem:[%s6112_s5 + $0x188] sm:$0xff] }
 0x328   :  { %v2730_v42 = vmax.f32 %v2724_v7, %v2725_v38  ;;  %4248 = vmatprep.subr.bf16.mxu1 %v4800_v21  ;;  %v4174_v35 = vpack.c.bf16 %v3726_v29, %v3725_v1  ;;  %v3727_v38 = vld [vmem:[%s6112_s5 + $0x120] sm:$0xff]  ;;  %v4195_v59 = vpack.c.bf16 %v3740_v51, %v3739_v56  ;;  %v3741_v61 = vld [vmem:[%s6112_s5 + $0x190] sm:$0xff]  ;;  %v3742_v62 = vld [vmem:[%s6112_s5 + $0x198] sm:$0xff] }
 0x329   :  { %v3743_v48 = vld [vmem:[%s6112_s5 + $0x1a0] sm:$0xff]  ;;  %v3744_v63 = vld [vmem:[%s6112_s5 + $0x1a8] sm:$0xff]  ;;  %v3745_v2 = vld [vmem:[%s6112_s5 + $0x1b0] sm:$0xff] }
 0x32a   :  { %v2734_v43 = vmax.f32 %v2730_v42, 0.0  ;;  %v3728_v42 = vld [vmem:[%s6112_s5 + $0x128] sm:$0xff]  ;;  %v4201_v0 = vpack.c.bf16 %v3744_v63, %v3743_v48  ;;  %v3747_v46 = vld [vmem:[%s6112_s5 + $0x1c0] sm:$0xff]  ;;  %v3749_v17 = vld [vmem:[%s6112_s5 + $0x1d0] sm:$0xff] }
 0x32b   :  { %4250 = vmatpush3.bf16.msra.mxu1 %v4249_v58  ;;  %v3748_v11 = vld [vmem:[%s6112_s5 + $0x1c8] sm:$0xff]  ;;  %v3751_v24 = vld [vmem:[%s6112_s5 + $0x1e0] sm:$0xff]  ;;  %v3753_v26 = vld [vmem:[%s6112_s5 + $0x1f0] sm:$0xff] }
 0x32c   :  { %2738 = vst [vmem:[#allocation5 + $0x38] sm:$0xff] %v2734_v43  ;;  %4251 = vmatprep.subr.bf16.mxu1 %v4800_v21  ;;  %v4177_v43 = vpack.c.bf16 %v3728_v42, %v3727_v38  ;;  %v4207_v14 = vpack.c.bf16 %v3748_v11, %v3747_v46  ;;  %v3752_v22 = vld [vmem:[%s6112_s5 + $0x1e8] sm:$0xff]  ;;  %v3755_v16 = vld [vmem:[%s6112_s5 + $0x200] sm:$0xff]  ;;  %v3758_v33 = vld [vmem:[%s6112_s5 + $0x218] sm:$0xff] }
 0x32d   :  { %v2748_v36 = vld [vmem:[#allocation5 + $0x28] sm:$0x1]  ;;  %v2842_v10 = vld [vmem:[#allocation5 + $0x2c] sm:$0x1]  ;;  %v2936_v54 = vld [vmem:[#allocation5 + $0x30] sm:$0x1]  ;;  %v4213_v3 = vpack.c.bf16 %v3752_v22, %v3751_v24 }
 0x32e   :  { %v2750_v39 = vrot.slane %v2748_v36, 7  ;;  %v2844_v27 = vrot.slane %v2842_v10, 7  ;;  %v4180_v36 = vpack.c.bf16 %v3730_v50, %v3729_v44  ;;  %v3756_v31 = vld [vmem:[%s6112_s5 + $0x208] sm:$0xff]  ;;  %v3761_v29 = vld [vmem:[%s6112_s5 + $0x230] sm:$0xff]  ;;  %v3763_v38 = vld [vmem:[%s6112_s5 + $0x240] sm:$0xff] }
 0x32f   :  { %4253 = vmatpush3.bf16.msra.mxu1 %v4252_v5  ;;  %v3746_v5 = vld [vmem:[%s6112_s5 + $0x1b8] sm:$0xff]  ;;  %v4219_v10 = vpack.c.bf16 %v3756_v31, %v3755_v16  ;;  %v3764_v42 = vld [vmem:[%s6112_s5 + $0x248] sm:$0xff]  ;;  %v3765_v44 = vld [vmem:[%s6112_s5 + $0x250] sm:$0xff] }
 0x330   :  { %v2753_v47 = vsel %vm2752_vm3, %v2747_v40, %v2750_v39  ;;  %4254 = vmatprep.subr.bf16.mxu1 %v4800_v21  ;;  %v2846_v7 = vsel %vm2752_vm3, %v2841_v25, %v2844_v27  ;;  %v3731_v39 = vld [vmem:[%s6112_s5 + $0x140] sm:$0xff]  ;;  %v3760_v25 = vld [vmem:[%s6112_s5 + $0x228] sm:$0xff]  ;;  %v3766_v50 = vld [vmem:[%s6112_s5 + $0x258] sm:$0xff] }
 0x331   :  { %3922 = vmatmul.mubr.f32.vlgmr.msra.gmra.mrb[20].mxu0 %v2753_v47  ;;  %v4186_v47 = vpack.c.bf16 %v3734_v9, %v3733_v45  ;;  %v3769_v45 = vld [vmem:[%s6112_s5 + $0x270] sm:$0xff]  ;;  %v3770_v9 = vld [vmem:[%s6112_s5 + $0x278] sm:$0xff]  ;;  %v3316_v56 = vld [vmem:[%s6115_s9 + $0x8] sm:$0xff] }
 0x332   :  { %4148 = vmatpush3.bf16.msra.mxu0 %v4147_v37  ;;  %3956 = vmatprep.mubr.msk.f32.mxu0 %vm4801_vm1, %v5773_v52  ;;  %v3732_v37 = vld [vmem:[%s6112_s5 + $0x148] sm:$0xff]  ;;  %v3232_v20 = vld [vmem:[%s6113_s7 + $0x70] sm:$0xff]  ;;  %v3319_v48 = vld [vmem:[%s6115_s9 + $0x20] sm:$0xff] }
 0x333   :  { %4149 = vmatprep.subr.bf16.mxu0 %v4800_v21  ;;  %4256 = vmatpush3.bf16.msra.mxu1 %v4255_v19  ;;  %v4183_v40 = vpack.c.bf16 %v3732_v37, %v3731_v39  ;;  %v3750_v19 = vld [vmem:[%s6112_s5 + $0x1d8] sm:$0xff]  ;;  %v3767_v39 = vld [vmem:[%s6112_s5 + $0x260] sm:$0xff]  ;;  %v3768_v37 = vld [vmem:[%s6112_s5 + $0x268] sm:$0xff] }
 0x334   :  { %4257 = vmatprep.subr.bf16.mxu1 %v4800_v21  ;;  %v3320_v63 = vld [vmem:[%s6115_s9 + $0x28] sm:$0xff]  ;;  %v3323_v46 = vld [vmem:[%s6115_s9 + $0x40] sm:$0xff] }
 0x335   :  { %v3324_v11 = vld [vmem:[%s6115_s9 + $0x48] sm:$0xff] }
 0x336   :  { %4151 = vmatpush3.bf16.msra.mxu0 %v4150_v49  ;;  %v3735_v49 = vld [vmem:[%s6112_s5 + $0x160] sm:$0xff] }
 0x337   :  { %4152 = vmatprep.subr.bf16.mxu0 %v4800_v21  ;;  %4259 = vmatpush3.bf16.msra.mxu1 %v4258_v23  ;;  %v4189_v12 = vpack.c.bf16 %v3736_v53, %v3735_v49  ;;  %v3754_v23 = vld [vmem:[%s6112_s5 + $0x1f8] sm:$0xff]  ;;  %v4240_v49 = vpack.c.bf16 %v3770_v9, %v3769_v45 }
 0x338   :  { %4260 = vmatprep.subr.bf16.mxu1 %v4800_v21  ;;  %v4216_v28 = vpack.c.bf16 %v3754_v23, %v3753_v26 }
 0x33a   :  { %4154 = vmatpush3.bf16.msra.mxu0 %v4153_v57  ;;  %v2938_v57 = vrot.slane %v2936_v54, 7  ;;  %v3706_v54 = vld [vmem:[%s6114_s6] ss:$0 sm:$0xff] }
 0x33b   :  { %4155 = vmatprep.subr.bf16.mxu0 %v4800_v21  ;;  %4262 = vmatpush3.bf16.msra.mxu1 %v4261_v15  ;;  %v3029_v15 = vld [vmem:[#allocation5 + $0xc] sm:$0x1] }
 0x33c   :  { %4092 = vmatprep.subr.mxu1 %v5773_v52  ;;  %v2940_v58 = vsel %vm2752_vm3, %v2935_v60, %v2938_v57 }
 0x33e   :  { %4157 = vmatpush3.bf16.msra.mxu0 %v4156_v41  ;;  %v4198_v41 = vpack.c.bf16 %v3742_v62, %v3741_v61  ;;  %v3317_v62 = vld [vmem:[%s6115_s9 + $0x10] sm:$0xff] }
 0x33f   :  { %4158 = vmatprep.subr.bf16.mxu0 %v4800_v21  ;;  %4093 = vmatpush3.msra.mxu1 %v3232_v20 }
 0x340   :  { %4263 = vmatprep.subr.bf16.mxu1 %v4800_v21 }
 0x342   :  { %4160 = vmatpush3.bf16.msra.mxu0 %v4159_v8  ;;  %v4204_v8 = vpack.c.bf16 %v3746_v5, %v3745_v2  ;;  %v3321_v2 = vld [vmem:[%s6115_s9 + $0x30] sm:$0xff]  ;;  %v3322_v5 = vld [vmem:[%s6115_s9 + $0x38] sm:$0xff] }
 0x343   :  { %4161 = vmatprep.subr.bf16.mxu0 %v4800_v21 }
 0x346   :  { %4163 = vmatpush3.bf16.msra.mxu0 %v4162_v4  ;;  %v4210_v4 = vpack.c.bf16 %v3750_v19, %v3749_v17  ;;  %v3325_v17 = vld [vmem:[%s6115_s9 + $0x50] sm:$0xf] }
 0x347   :  { %4164 = vmatprep.subr.bf16.mxu0 %v4800_v21 }
 0x34a   :  { %4166 = vmatpush3.bf16.msra.mxu0 %v4165_v6  ;;  %v3030_v6 = vld [vmem:[#allocation5 + $0x34] sm:$0x1] }
 0x34b   :  { %4167 = vmatprep.subr.bf16.mxu0 %v4800_v21  ;;  %v3032_v32 = vrot.slane %v3030_v6, 7 }
 0x34d   :  { %v3034_v34 = vsel %vm2752_vm3, %v3029_v15, %v3032_v32 }
 0x34e   :  { %4169 = vmatpush3.bf16.msra.mxu0 %v4168_v18  ;;  %v3757_v18 = vld [vmem:[%s6112_s5 + $0x210] sm:$0xff] }
 0x34f   :  { %4170 = vmatprep.subr.bf16.mxu0 %v4800_v21  ;;  %v4222_v27 = vpack.c.bf16 %v3758_v33, %v3757_v18 }
 0x351   :  { %3957 = vmatmul.mubr.f32.vlgmr.msra.gmra.mrb[20].mxu0 %v2846_v7  ;;  %v3762_v7 = vld [vmem:[%s6112_s5 + $0x238] sm:$0xff] }
 0x352   :  { %4172 = vmatpush3.bf16.msra.mxu0 %v4171_v30  ;;  %3991 = vmatprep.mubr.msk.f32.mxu0 %vm4801_vm1, %v5773_v52  ;;  %v3759_v30 = vld [vmem:[%s6112_s5 + $0x220] sm:$0xff] }
 0x353   :  { %4173 = vmatprep.subr.bf16.mxu0 %v4800_v21  ;;  %v4225_v1 = vpack.c.bf16 %v3760_v25, %v3759_v30 }
 0x356   :  { %4175 = vmatpush3.bf16.msra.mxu0 %v4174_v35  ;;  %v4228_v35 = vpack.c.bf16 %v3762_v7, %v3761_v29 }
 0x357   :  { %4176 = vmatprep.subr.bf16.mxu0 %v4800_v21 }
 0x35a   :  { %4178 = vmatpush3.bf16.msra.mxu0 %v4177_v43  ;;  %v4231_v43 = vpack.c.bf16 %v3764_v42, %v3763_v38 }
 0x35b   :  { %4179 = vmatprep.subr.bf16.mxu0 %v4800_v21 }
 0x35e   :  { %4181 = vmatpush3.bf16.msra.mxu0 %v4180_v36  ;;  %v4234_v36 = vpack.c.bf16 %v3766_v50, %v3765_v44 }
 0x35f   :  { %4182 = vmatprep.subr.bf16.mxu0 %v4800_v21 }
 0x362   :  { %4184 = vmatpush3.bf16.msra.mxu0 %v4183_v40  ;;  %v4237_v40 = vpack.c.bf16 %v3768_v37, %v3767_v39 }
 0x363   :  { %4185 = vmatprep.subr.bf16.mxu0 %v4800_v21 }
 0x366   :  { %4187 = vmatpush3.bf16.msra.mxu0 %v4186_v47  ;;  %v3124_v47 = vld [vmem:[#allocation5 + $0x38] sm:$0x1] }
 0x367   :  { %4188 = vmatprep.subr.bf16.mxu0 %v4800_v21  ;;  %v3126_v53 = vrot.slane %v3124_v47, 7 }
 0x36a   :  { %4190 = vmatpush3.bf16.msra.mxu0 %v4189_v12  ;;  %v3123_v12 = vld [vmem:[#allocation5 + $0x10] sm:$0x1] }
 0x36b   :  { %4191 = vmatprep.subr.bf16.mxu0 %v4800_v21  ;;  %v3128_v13 = vsel %vm2752_vm3, %v3123_v12, %v3126_v53 }
 0x36e   :  { %4193 = vmatpush3.bf16.msra.mxu0 %v4192_v55  ;;  %v3315_v55 = vld [vmem:[%s6115_s9] sm:$0xff] }
 0x36f   :  { %4194 = vmatprep.subr.bf16.mxu0 %v4800_v21  ;;  %v4264_v60 = vpack.c.bf16 %v3316_v56, %v3315_v55 }
 0x371   :  { %3992 = vmatmul.mubr.f32.vlgmr.msra.gmra.mrb[20].mxu0 %v2940_v58  ;;  %v3318_v58 = vld [vmem:[%s6115_s9 + $0x18] sm:$0xff] }
 0x372   :  { %4196 = vmatpush3.bf16.msra.mxu0 %v4195_v59  ;;  %4026 = vmatprep.mubr.msk.f32.mxu0 %vm4801_vm1, %v5773_v52 }
 0x373   :  { %4197 = vmatprep.subr.bf16.mxu0 %v4800_v21 }
 0x376   :  { %4199 = vmatpush3.bf16.msra.mxu0 %v4198_v41  ;;  %v4267_v41 = vpack.c.bf16 %v3318_v58, %v3317_v62 }
 0x377   :  { %4200 = vmatprep.subr.bf16.mxu0 %v4800_v21 }
 0x37a   :  { %4202 = vmatpush3.bf16.msra.mxu0 %v4201_v0  ;;  %v4270_v0 = vpack.c.bf16 %v3320_v63, %v3319_v48 }
 0x37b   :  { %4203 = vmatprep.subr.bf16.mxu0 %v4800_v21 }
 0x37e   :  { %4205 = vmatpush3.bf16.msra.mxu0 %v4204_v8  ;;  %v4273_v8 = vpack.c.bf16 %v3322_v5, %v3321_v2 }
 0x37f   :  { %4206 = vmatprep.subr.bf16.mxu0 %v4800_v21 }
 0x382   :  { %4208 = vmatpush3.bf16.msra.mxu0 %v4207_v14  ;;  %v4276_v14 = vpack.c.bf16 %v3324_v11, %v3323_v46 }
 0x383   :  { %4209 = vmatprep.subr.bf16.mxu0 %v4800_v21 }
 0x386   :  { %4211 = vmatpush3.bf16.msra.mxu0 %v4210_v4 }
 0x387   :  { %4212 = vmatprep.subr.bf16.mxu0 %v4800_v21 }
 0x38a   :  { %4214 = vmatpush3.bf16.msra.mxu0 %v4213_v3  ;;  %v3773_v3 = vld [vmem:[%s6118_s10] ss:$0 sm:$0xff] }
 0x38b   :  { %4215 = vmatprep.subr.bf16.mxu0 %v4800_v21 }
 0x38e   :  { %4217 = vmatpush3.bf16.msra.mxu0 %v4216_v28 }
 0x38f   :  { %4218 = vmatprep.subr.bf16.mxu0 %v4800_v21 }
 0x391   :  { %4027 = vmatmul.mubr.f32.vlgmr.msra.gmra.mrb[20].mxu0 %v3034_v34 }
 0x392   :  { %4220 = vmatpush3.bf16.msra.mxu0 %v4219_v10  ;;  %4061 = vmatprep.mubr.msk.f32.mxu0 %vm4801_vm1, %v5773_v52 }
 0x393   :  { %4221 = vmatprep.subr.bf16.mxu0 %v4800_v21 }
 0x396   :  { %4223 = vmatpush3.bf16.msra.mxu0 %v4222_v27 }
 0x397   :  { %4224 = vmatprep.subr.bf16.mxu0 %v4800_v21 }
 0x39a   :  { %4226 = vmatpush3.bf16.msra.mxu0 %v4225_v1 }
 0x39b   :  { %4227 = vmatprep.subr.bf16.mxu0 %v4800_v21 }
 0x39e   :  { %4229 = vmatpush3.bf16.msra.mxu0 %v4228_v35 }
 0x39f   :  { %4230 = vmatprep.subr.bf16.mxu0 %v4800_v21 }
 0x3a2   :  { %4232 = vmatpush3.bf16.msra.mxu0 %v4231_v43 }
 0x3a3   :  { %4233 = vmatprep.subr.bf16.mxu0 %v4800_v21 }
 0x3a6   :  { %4235 = vmatpush3.bf16.msra.mxu0 %v4234_v36 }
 0x3a7   :  { %4236 = vmatprep.subr.bf16.mxu0 %v4800_v21 }
 0x3aa   :  { %4238 = vmatpush3.bf16.msra.mxu0 %v4237_v40 }
 0x3ab   :  { %4239 = vmatprep.subr.bf16.mxu0 %v4800_v21 }
 0x3ae   :  { %4241 = vmatpush3.bf16.msra.mxu0 %v4240_v49 }
 0x3b1   :  { %4062 = vmatmul.mubr.f32.vlgmr.msra.gmra.mrb[20].mxu0 %v3128_v13 }
 0x484   :  { %v3212_v51 = vpop.f32.mrb[20].mxu0 }
 0x485   :  { %v4404_v57 = vadd.f32 %v3706_v54, %v3212_v51  ;;  %v4063_v59 = vpop.f32.mrb[21].mxu0 }
 0x487   :  { %v3217_v61 = vmax.f32 %v4404_v57, 0.0 }
 0x489   :  { %4095 = vmatmul.mubr.msk.f32.vlgmr.msra.gmra.mrb[40].mxu1 %vm3240_vm4, %v3217_v61 }
 0x48a   :  { %4265 = vmatpush3.bf16.msra.mxu1 %v4264_v60  ;;  %4119 = vmatprep.mubr.msk.f32.mxu1 %vm4801_vm1, %v5773_v52 }
 0x48b   :  { %4266 = vmatprep.subr.bf16.mxu1 %v4800_v21 }
 0x48e   :  { %4268 = vmatpush3.bf16.msra.mxu1 %v4267_v41 }
 0x48f   :  { %4269 = vmatprep.subr.bf16.mxu1 %v4800_v21 }
 0x492   :  { %4271 = vmatpush3.bf16.msra.mxu1 %v4270_v0 }
 0x493   :  { %4272 = vmatprep.subr.bf16.mxu1 %v4800_v21 }
 0x496   :  { %4274 = vmatpush3.bf16.msra.mxu1 %v4273_v8 }
 0x497   :  { %4275 = vmatprep.subr.bf16.mxu1 %v4800_v21  ;;  %v3771_v21 = vld [vmem:[%s6117_s8] ss:$0 sm:$0xff] }
 0x49a   :  { %4277 = vmatpush3.bf16.msra.mxu1 %v4276_v14 }
 0x49b   :  { %4117 = vmatprep.subr.mxu1 %v5773_v52 }
 0x49e   :  { %4118 = vmatpush3.msk.msra.mxu1 %vm3337_vm5, %v3325_v17 }
 0x55c   :  { %v3310_v19 = vpop.f32.mrb[40].mxu1 }
 0x55d   :  { %v3311_v4 = vadd.f32 %v3771_v21, %v3310_v19  ;;  %v4096_v24 = vpop.f32.mrb[41].mxu1 }
 0x55f   :  { %v3314_v22 = vmax.f32 %v3311_v4, 0.0 }
 0x561   :  { %4120 = vmatmul.mubr.msk.f32.vlgmr.msra.gmra.mrb[42].mxu1 %vm3333_vm6, %v3314_v22 }
 0x634   :  { %v3407_v26 = vpop.f32.mrb[42].mxu1 }
 0x635   :  { %v3408_v23 = vadd.f32 %v3773_v3, %v3407_v26  ;;  %v4121_v6 = vpop.f32.mrb[43].mxu1 }
 0x637   :  { %3413 = vst.msk [vmem:[%s6116_s11] sm:$0x3] %vm3412_vm7, %v3408_v23 }

</bundles_post_ra>
